<compile_context>
chip_gen: v6e
topology: v6e:2x2x1
jax: 0.10.0
libtpu: 0.0.40
codegen_flags: <defaults>
</compile_context>

<pallas_src>
import math
import functools

import jax
import jax.numpy as jnp
import numpy as np
from jax.experimental import pallas as pl
from jax.experimental.pallas import tpu as pltpu


# ----------------------------- kernel ---------------------------------------

def _layernorm(v, w, b, eps=1e-5):
    # v: [R, D] f32, w/b: [1, D] f32
    mu = jnp.mean(v, axis=-1, keepdims=True)
    var = jnp.mean((v - mu) ** 2, axis=-1, keepdims=True)
    return (v - mu) * jax.lax.rsqrt(var + eps) * w + b


def encoder_kernel(h, d_k, tq, scale,
                   x_ref, bias_ref,
                   ln1w_ref, ln1b_ref,
                   wq_ref, bq_ref, wkv_ref, bkv_ref, wo_ref, bo_ref,
                   ln2w_ref, ln2b_ref,
                   w1_ref, b1_ref, w2_ref, b2_ref,
                   lnfw_ref, lnfb_ref,
                   o_ref,
                   k_scratch, v_scratch):
    # One grid step == (one batch element, one query tile).
    D = h * d_k
    cdt = wq_ref.dtype              # MXU operand / KV-scratch dtype (bf16 or f32)
    approx = cdt == jnp.bfloat16    # static: EUP approx reciprocal only in bf16 mode
    t = pl.program_id(1)

    # ---- persisted full-sequence LN1 + fused K/V projection (once per batch) ----
    @pl.when(t == 0)
    def _():
        x_full = x_ref[0]                                            # [S, D] f32
        xn_full = _layernorm(x_full, ln1w_ref[...], ln1b_ref[...])
        kvp = jnp.dot(xn_full.astype(cdt), wkv_ref[...],
                      preferred_element_type=jnp.float32) + bkv_ref[...]   # [S, 2D] f32
        kvp = kvp.astype(cdt)
        # head-major layouts so the per-tile attention needs no K/V relayout
        k_scratch[...] = jnp.stack(
            [kvp[:, i * d_k:(i + 1) * d_k] for i in range(h)], axis=0)      # [h, S, d_k]
        v_scratch[...] = jnp.stack(
            [kvp[:, D + i * d_k:D + (i + 1) * d_k] for i in range(h)], axis=0)

    # ---- query tile (sliced out of the resident full-sequence block) ----
    row0 = pl.multiple_of(t * tq, tq)
    x_t = x_ref[0, pl.ds(row0, tq), :]               # [TQ, D] f32
    abias = bias_ref[0]                              # [1, S]  f32 additive mask bias

    # ---- sublayer 1: x + SelfAttention(LayerNorm(x)) ----
    xn_t = _layernorm(x_t, ln1w_ref[...], ln1b_ref[...])
    q = jnp.dot(xn_t.astype(cdt), wq_ref[...],
                preferred_element_type=jnp.float32) + bq_ref[...]    # [TQ, D] f32
    q = q * scale                                    # fold 1/sqrt(d_k) into q
    qh = jnp.stack([q[:, i * d_k:(i + 1) * d_k] for i in range(h)],
                   axis=0).astype(cdt)               # [h, TQ, d_k]

    # batched over heads: scores, masked softmax, context
    s = jnp.einsum('hqd,hkd->hqk', qh, k_scratch[...],
                   preferred_element_type=jnp.float32)               # [h, TQ, S]
    s = s + abias                                    # additive mask (0 / -1e9)
    s = s - jnp.max(s, axis=-1, keepdims=True)
    p = jnp.exp(s)
    p = p * pl.reciprocal(jnp.sum(p, axis=-1, keepdims=True), approx=approx)

    ctx = jnp.einsum('hqk,hkd->hqd', p.astype(cdt), v_scratch[...],
                     preferred_element_type=jnp.float32)             # [h, TQ, d_k]
    attn = jnp.concatenate([ctx[i] for i in range(h)], axis=-1)      # [TQ, D] dense

    attn_out = jnp.dot(attn.astype(cdt), wo_ref[...],
                       preferred_element_type=jnp.float32) + bo_ref[...]
    x1 = x_t + attn_out

    # ---- sublayer 2: x1 + FeedForward(LayerNorm(x1)) ----
    xn2 = _layernorm(x1, ln2w_ref[...], ln2b_ref[...])
    hid = jnp.dot(xn2.astype(cdt), w1_ref[...],
                  preferred_element_type=jnp.float32) + b1_ref[...]
    hid = jnp.maximum(hid, 0.0)
    ff = jnp.dot(hid.astype(cdt), w2_ref[...],
                 preferred_element_type=jnp.float32) + b2_ref[...]
    x2 = x1 + ff

    # ---- final LayerNorm ----
    o_ref[0] = _layernorm(x2, lnfw_ref[...], lnfb_ref[...])


# ----------------------------- wrapper ---------------------------------------

def _vmem_limit_bytes():
    # Headroom below physical VMEM: 128 MiB (v5e/v6e) -> 96 MiB; 64 MiB (v7x) -> 48 MiB.
    cap = 128 * 1024 * 1024
    try:
        cap = int(pltpu.get_tpu_info().vmem_capacity_bytes)
    except Exception:
        pass
    return min(cap * 3 // 4, 96 * 1024 * 1024)


def encoder_forward(x, mask, params, *, h, use_bf16=True, block_q=None):
    """x: [B, S, D] f32, mask: [B, 1, S] int (1=keep, 0=mask), params: dict."""
    B, S, D = x.shape
    d_ff = params['w1'].shape[1]
    assert D % h == 0
    d_k = D // h

    cdt = jnp.bfloat16 if use_bf16 else jnp.float32

    # --- param packing: fuse K/V weights, cast matmul weights to compute dtype ---
    wq = params['wq'].astype(cdt)
    wkv = jnp.concatenate([params['wk'], params['wv']], axis=1).astype(cdt)   # [D, 2D]
    bq = params['bq'].astype(jnp.float32)
    bkv = jnp.concatenate([params['bk'], params['bv']], axis=1).astype(jnp.float32)
    wo = params['wo'].astype(cdt)
    w1 = params['w1'].astype(cdt)
    w2 = params['w2'].astype(cdt)

    # additive attention-mask bias: 0 where keep, -1e9 where masked
    mask_bias = (mask.astype(jnp.float32) - 1.0) * 1e9                        # [B, 1, S]

    param_args = [
        params['ln1w'], params['ln1b'],
        wq, bq, wkv, bkv, wo, params['bo'].astype(jnp.float32),
        params['ln2w'], params['ln2b'],
        w1, params['b1'].astype(jnp.float32), w2, params['b2'].astype(jnp.float32),
        params['lnfw'], params['lnfb'],
    ]

    # --- query tiling: fill the 256-wide MXU M dim when S allows ---
    if block_q is not None:
        tq = block_q
    elif S <= 128:
        tq = S
    elif S % 256 == 0:
        tq = 256
    else:
        tq = 128
    assert S % tq == 0, "S must be a multiple of the query tile"  # TODO(synk): ragged S
    n_t = S // tq

    def full_spec(arr):
        return pl.BlockSpec(arr.shape, lambda b, t, _nd=arr.ndim: (0,) * _nd)

    in_specs = [
        pl.BlockSpec((1, S, D), lambda b, t: (b, 0, 0)),    # x (full sequence, resident)
        pl.BlockSpec((1, 1, S), lambda b, t: (b, 0, 0)),    # additive mask bias
    ] + [full_spec(a) for a in param_args]

    out_spec = pl.BlockSpec((1, tq, D), lambda b, t: (b, t, 0))

    kernel = functools.partial(encoder_kernel, h, d_k, tq, 1.0 / math.sqrt(d_k))

    # --- advisory cost estimate (K/V proj once per batch, x DMA'd once) ---
    flops = int(B * (2 * S * D * (2 * D)      # fused K/V projection (per batch)
                     + 2 * S * D * D          # Q projection
                     + 4 * S * S * D          # scores + p@V
                     + 2 * S * D * D          # output projection
                     + 4 * S * D * d_ff))     # FFN
    transcendentals = int(B * h * S * S)
    bytes_accessed = int(2 * x.nbytes + mask_bias.nbytes
                         + sum(int(a.nbytes) for a in param_args))

    return pl.pallas_call(
        kernel,
        out_shape=jax.ShapeDtypeStruct((B, S, D), jnp.float32),
        grid_spec=pltpu.PrefetchScalarGridSpec(
            num_scalar_prefetch=0,
            grid=(B, n_t),
            in_specs=in_specs,
            out_specs=out_spec,
            scratch_shapes=[
                pltpu.VMEM((h, S, d_k), cdt),   # persisted K (compute dtype)
                pltpu.VMEM((h, S, d_k), cdt),   # persisted V (compute dtype)
            ],
        ),
        compiler_params=pltpu.CompilerParams(
            # t must be sequential so the K/V scratch persists across query tiles.
            dimension_semantics=("parallel", "arbitrary"),
            vmem_limit_bytes=_vmem_limit_bytes(),
        ),
        cost_estimate=pl.CostEstimate(flops=flops,
                                      transcendentals=transcendentals,
                                      bytes_accessed=bytes_accessed),
    )(x, mask_bias, *param_args)


# --------------------------- reference (pure JAX, f32) -----------------------

def encoder_reference(x, mask, p, *, h):
    B, S, D = x.shape
    d_k = D // h

    def ln(v, w, b):
        mu = jnp.mean(v, axis=-1, keepdims=True)
        var = jnp.mean((v - mu) ** 2, axis=-1, keepdims=True)
        return (v - mu) / jnp.sqrt(var + 1e-5) * w + b

    xn = ln(x, p['ln1w'][0], p['ln1b'][0])
    q = xn @ p['wq'] + p['bq'][0]
    k = xn @ p['wk'] + p['bk'][0]
    v = xn @ p['wv'] + p['bv'][0]
    qh = q.reshape(B, S, h, d_k).transpose(0, 2, 1, 3)
    kh = k.reshape(B, S, h, d_k).transpose(0, 2, 1, 3)
    vh = v.reshape(B, S, h, d_k).transpose(0, 2, 1, 3)
    scores = jnp.einsum('bhqd,bhkd->bhqk', qh, kh) / math.sqrt(d_k)
    m = mask[:, None, :, :]  # [B,1,1,S]
    scores = jnp.where(m == 0, -1e9, scores)
    pa = jax.nn.softmax(scores, axis=-1)
    att = jnp.einsum('bhqk,bhkd->bhqd', pa, vh).transpose(0, 2, 1, 3).reshape(B, S, D)
    x1 = x + (att @ p['wo'] + p['bo'][0])
    xn2 = ln(x1, p['ln2w'][0], p['ln2b'][0])
    ff = jnp.maximum(xn2 @ p['w1'] + p['b1'][0], 0.0) @ p['w2'] + p['b2'][0]
    x2 = x1 + ff
    return ln(x2, p['lnfw'][0], p['lnfb'][0])


# --------------------------------- main ---------------------------------------

if __name__ == "__main__":
    B, S, D, H, DFF = 2, 8, 32, 4, 64

    key = jax.random.PRNGKey(0)
    keys = jax.random.split(key, 16)

    def w(k, shape, scale=0.05):
        return (scale * jax.random.normal(k, shape)).astype(jnp.float32)

    params = {
        # self-attention projections (stored [in, out])
        'wq': w(keys[0], (D, D)), 'bq': w(keys[1], (1, D)),
        'wk': w(keys[2], (D, D)), 'bk': w(keys[3], (1, D)),
        'wv': w(keys[4], (D, D)), 'bv': w(keys[5], (1, D)),
        'wo': w(keys[6], (D, D)), 'bo': w(keys[7], (1, D)),
        # feed-forward
        'w1': w(keys[8], (D, DFF)), 'b1': w(keys[9], (1, DFF)),
        'w2': w(keys[10], (DFF, D)), 'b2': w(keys[11], (1, D)),
        # layernorms (PyTorch default init: weight=1, bias=0)
        'ln1w': jnp.ones((1, D), jnp.float32), 'ln1b': jnp.zeros((1, D), jnp.float32),
        'ln2w': jnp.ones((1, D), jnp.float32), 'ln2b': jnp.zeros((1, D), jnp.float32),
        'lnfw': jnp.ones((1, D), jnp.float32), 'lnfb': jnp.zeros((1, D), jnp.float32),
    }

    x = jax.random.normal(keys[12], (B, S, D), dtype=jnp.float32)
    # mask: 1 = attend, 0 = masked; last two key positions of batch 1 are padding
    mask = np.ones((B, 1, S), dtype=np.int32)
    mask[1, 0, -2:] = 0
    mask = jnp.asarray(mask)

    ref = encoder_reference(x, mask, params, h=H)

    # 1) strict-math path (f32 MXU operands / f32 KV scratch, exact reciprocal)
    out_f32 = jax.block_until_ready(encoder_forward(x, mask, params, h=H, use_bf16=False))
    np.testing.assert_allclose(np.asarray(out_f32), np.asarray(ref), rtol=1e-4, atol=1e-4)

    # 2) performance path (bf16 MXU operands / bf16 KV scratch, f32 accumulation)
    out_bf16 = jax.block_until_ready(encoder_forward(x, mask, params, h=H, use_bf16=True))
    np.testing.assert_allclose(np.asarray(out_bf16), np.asarray(ref), rtol=2e-2, atol=2e-2)

    print("KERNEL_OK")
</pallas_src>

<mosaic_0001>
module attributes {stable_mosaic.version = 11 : i64} {
  func.func @encoder_kernel(%arg0: i32, %arg1: i32, %arg2: memref<1x8x32xf32, #tpu.memory_space<vmem>>, %arg3: memref<1x1x8xf32, #tpu.memory_space<vmem>>, %arg4: memref<1x32xf32, #tpu.memory_space<vmem>>, %arg5: memref<1x32xf32, #tpu.memory_space<vmem>>, %arg6: memref<32x32xf32, #tpu.memory_space<vmem>>, %arg7: memref<1x32xf32, #tpu.memory_space<vmem>>, %arg8: memref<32x64xf32, #tpu.memory_space<vmem>>, %arg9: memref<1x64xf32, #tpu.memory_space<vmem>>, %arg10: memref<32x32xf32, #tpu.memory_space<vmem>>, %arg11: memref<1x32xf32, #tpu.memory_space<vmem>>, %arg12: memref<1x32xf32, #tpu.memory_space<vmem>>, %arg13: memref<1x32xf32, #tpu.memory_space<vmem>>, %arg14: memref<32x64xf32, #tpu.memory_space<vmem>>, %arg15: memref<1x64xf32, #tpu.memory_space<vmem>>, %arg16: memref<64x32xf32, #tpu.memory_space<vmem>>, %arg17: memref<1x32xf32, #tpu.memory_space<vmem>>, %arg18: memref<1x32xf32, #tpu.memory_space<vmem>>, %arg19: memref<1x32xf32, #tpu.memory_space<vmem>>, %arg20: memref<1x8x32xf32, #tpu.memory_space<vmem>>, %arg21: memref<4x8x8xf32, #tpu.memory_space<vmem>>, %arg22: memref<4x8x8xf32, #tpu.memory_space<vmem>>) attributes {dimension_semantics = [#tpu.dimension_semantics<parallel>, #tpu.dimension_semantics<arbitrary>], iteration_bounds = array<i64: 2, 1>, scalar_prefetch = 0 : i64, scratch_operands = 2 : i64, tpu.core_type = #tpu.core_type<tc>, window_params = [{transform_indices = @transform_0, window_bounds = array<i64: 1, 8, 32>}, {transform_indices = @transform_1, window_bounds = array<i64: 1, 1, 8>}, {pipeline_mode = #tpu.pipeline_mode<synchronous>, transform_indices = @transform_2, window_bounds = array<i64: 1, 32>}, {pipeline_mode = #tpu.pipeline_mode<synchronous>, transform_indices = @transform_3, window_bounds = array<i64: 1, 32>}, {pipeline_mode = #tpu.pipeline_mode<synchronous>, transform_indices = @transform_4, window_bounds = array<i64: 32, 32>}, {pipeline_mode = #tpu.pipeline_mode<synchronous>, transform_indices = @transform_5, window_bounds = array<i64: 1, 32>}, {pipeline_mode = #tpu.pipeline_mode<synchronous>, transform_indices = @transform_6, window_bounds = array<i64: 32, 64>}, {pipeline_mode = #tpu.pipeline_mode<synchronous>, transform_indices = @transform_7, window_bounds = array<i64: 1, 64>}, {pipeline_mode = #tpu.pipeline_mode<synchronous>, transform_indices = @transform_8, window_bounds = array<i64: 32, 32>}, {pipeline_mode = #tpu.pipeline_mode<synchronous>, transform_indices = @transform_9, window_bounds = array<i64: 1, 32>}, {pipeline_mode = #tpu.pipeline_mode<synchronous>, transform_indices = @transform_10, window_bounds = array<i64: 1, 32>}, {pipeline_mode = #tpu.pipeline_mode<synchronous>, transform_indices = @transform_11, window_bounds = array<i64: 1, 32>}, {pipeline_mode = #tpu.pipeline_mode<synchronous>, transform_indices = @transform_12, window_bounds = array<i64: 32, 64>}, {pipeline_mode = #tpu.pipeline_mode<synchronous>, transform_indices = @transform_13, window_bounds = array<i64: 1, 64>}, {pipeline_mode = #tpu.pipeline_mode<synchronous>, transform_indices = @transform_14, window_bounds = array<i64: 64, 32>}, {pipeline_mode = #tpu.pipeline_mode<synchronous>, transform_indices = @transform_15, window_bounds = array<i64: 1, 32>}, {pipeline_mode = #tpu.pipeline_mode<synchronous>, transform_indices = @transform_16, window_bounds = array<i64: 1, 32>}, {pipeline_mode = #tpu.pipeline_mode<synchronous>, transform_indices = @transform_17, window_bounds = array<i64: 1, 32>}, {transform_indices = @transform_18, window_bounds = array<i64: 1, 8, 32>}]} {
    %c0_i32 = arith.constant 0 : i32
    %0 = arith.cmpi eq, %arg1, %c0_i32 : i32
    %1 = arith.extui %0 : i1 to i32
    %c0_i32_0 = arith.constant 0 : i32
    %2 = arith.cmpi ne, %1, %c0_i32_0 : i32
    scf.if %2 {
      %c0_66 = arith.constant 0 : index
      %c0_67 = arith.constant 0 : index
      %c0_68 = arith.constant 0 : index
      %146 = vector.load %arg2[%c0_66, %c0_67, %c0_68] : memref<1x8x32xf32, #tpu.memory_space<vmem>>, vector<1x8x32xf32>
      %147 = vector.shape_cast %146 : vector<1x8x32xf32> to vector<8x32xf32>
      %c0_69 = arith.constant 0 : index
      %c0_70 = arith.constant 0 : index
      %148 = vector.load %arg4[%c0_69, %c0_70] : memref<1x32xf32, #tpu.memory_space<vmem>>, vector<1x32xf32>
      %c0_71 = arith.constant 0 : index
      %c0_72 = arith.constant 0 : index
      %149 = vector.load %arg5[%c0_71, %c0_72] : memref<1x32xf32, #tpu.memory_space<vmem>>, vector<1x32xf32>
      %cst_73 = arith.constant dense<0.000000e+00> : vector<8xf32>
      %150 = vector.multi_reduction <add>, %147, %cst_73 [1] : vector<8x32xf32> to vector<8xf32>
      %151 = vector.shape_cast %150 : vector<8xf32> to vector<8x1xf32>
      %cst_74 = arith.constant 3.200000e+01 : f32
      %152 = vector.broadcast %cst_74 : f32 to vector<8x1xf32>
      %153 = arith.divf %151, %152 : vector<8x1xf32>
      %154 = vector.broadcast %153 : vector<8x1xf32> to vector<8x32xf32>
      %155 = arith.subf %147, %154 : vector<8x32xf32>
      %156 = arith.mulf %155, %155 : vector<8x32xf32>
      %cst_75 = arith.constant dense<0.000000e+00> : vector<8xf32>
      %157 = vector.multi_reduction <add>, %156, %cst_75 [1] : vector<8x32xf32> to vector<8xf32>
      %158 = vector.shape_cast %157 : vector<8xf32> to vector<8x1xf32>
      %cst_76 = arith.constant 3.200000e+01 : f32
      %159 = vector.broadcast %cst_76 : f32 to vector<8x1xf32>
      %160 = arith.divf %158, %159 : vector<8x1xf32>
      %161 = vector.broadcast %153 : vector<8x1xf32> to vector<8x32xf32>
      %162 = arith.subf %147, %161 : vector<8x32xf32>
      %cst_77 = arith.constant 9.99999974E-6 : f32
      %163 = vector.broadcast %cst_77 : f32 to vector<8x1xf32>
      %164 = arith.addf %160, %163 : vector<8x1xf32>
      %165 = math.rsqrt %164 : vector<8x1xf32>
      %166 = vector.broadcast %165 : vector<8x1xf32> to vector<8x32xf32>
      %167 = arith.mulf %162, %166 : vector<8x32xf32>
      %168 = vector.broadcast %148 : vector<1x32xf32> to vector<8x32xf32>
      %169 = arith.mulf %167, %168 : vector<8x32xf32>
      %170 = vector.broadcast %149 : vector<1x32xf32> to vector<8x32xf32>
      %171 = arith.addf %169, %170 : vector<8x32xf32>
      %c0_78 = arith.constant 0 : index
      %c0_79 = arith.constant 0 : index
      %172 = vector.load %arg8[%c0_78, %c0_79] : memref<32x64xf32, #tpu.memory_space<vmem>>, vector<32x64xf32>
      %cst_80 = arith.constant dense<0.000000e+00> : vector<8x64xf32>
      %173 = tpu.matmul %171, %172, %cst_80 {dimension_numbers = #tpu.dot_dimension_numbers<[1], [0], [0], [1], [0, 0, 1, 1], [], []>} : vector<8x32xf32>, vector<32x64xf32>, vector<8x64xf32> -> vector<8x64xf32>
      %c0_81 = arith.constant 0 : index
      %c0_82 = arith.constant 0 : index
      %174 = vector.load %arg9[%c0_81, %c0_82] : memref<1x64xf32, #tpu.memory_space<vmem>>, vector<1x64xf32>
      %175 = vector.broadcast %174 : vector<1x64xf32> to vector<8x64xf32>
      %176 = arith.addf %173, %175 : vector<8x64xf32>
      %177 = vector.extract_strided_slice %176 {offsets = [0, 0], sizes = [8, 8], strides = [1, 1]} : vector<8x64xf32> to vector<8x8xf32>
      %178 = vector.extract_strided_slice %176 {offsets = [0, 8], sizes = [8, 8], strides = [1, 1]} : vector<8x64xf32> to vector<8x8xf32>
      %179 = vector.extract_strided_slice %176 {offsets = [0, 16], sizes = [8, 8], strides = [1, 1]} : vector<8x64xf32> to vector<8x8xf32>
      %180 = vector.extract_strided_slice %176 {offsets = [0, 24], sizes = [8, 8], strides = [1, 1]} : vector<8x64xf32> to vector<8x8xf32>
      %181 = vector.shape_cast %177 : vector<8x8xf32> to vector<1x8x8xf32>
      %182 = vector.shape_cast %178 : vector<8x8xf32> to vector<1x8x8xf32>
      %183 = vector.shape_cast %179 : vector<8x8xf32> to vector<1x8x8xf32>
      %184 = vector.shape_cast %180 : vector<8x8xf32> to vector<1x8x8xf32>
      %185 = tpu.concatenate %181, %182, %183, %184 in 0 : vector<1x8x8xf32>, vector<1x8x8xf32>, vector<1x8x8xf32>, vector<1x8x8xf32> -> vector<4x8x8xf32>
      %c0_83 = arith.constant 0 : index
      %c0_84 = arith.constant 0 : index
      %c0_85 = arith.constant 0 : index
      %186 = vector.load %arg21[%c0_83, %c0_84, %c0_85] : memref<4x8x8xf32, #tpu.memory_space<vmem>>, vector<4x8x8xf32>
      tpu.vector_store %arg21[%c0_83, %c0_84, %c0_85], %185 {strides = array<i32>} : memref<4x8x8xf32, #tpu.memory_space<vmem>>, vector<4x8x8xf32>,
      %187 = vector.extract_strided_slice %176 {offsets = [0, 32], sizes = [8, 8], strides = [1, 1]} : vector<8x64xf32> to vector<8x8xf32>
      %188 = vector.extract_strided_slice %176 {offsets = [0, 40], sizes = [8, 8], strides = [1, 1]} : vector<8x64xf32> to vector<8x8xf32>
      %189 = vector.extract_strided_slice %176 {offsets = [0, 48], sizes = [8, 8], strides = [1, 1]} : vector<8x64xf32> to vector<8x8xf32>
      %190 = vector.extract_strided_slice %176 {offsets = [0, 56], sizes = [8, 8], strides = [1, 1]} : vector<8x64xf32> to vector<8x8xf32>
      %191 = vector.shape_cast %187 : vector<8x8xf32> to vector<1x8x8xf32>
      %192 = vector.shape_cast %188 : vector<8x8xf32> to vector<1x8x8xf32>
      %193 = vector.shape_cast %189 : vector<8x8xf32> to vector<1x8x8xf32>
      %194 = vector.shape_cast %190 : vector<8x8xf32> to vector<1x8x8xf32>
      %195 = tpu.concatenate %191, %192, %193, %194 in 0 : vector<1x8x8xf32>, vector<1x8x8xf32>, vector<1x8x8xf32>, vector<1x8x8xf32> -> vector<4x8x8xf32>
      %c0_86 = arith.constant 0 : index
      %c0_87 = arith.constant 0 : index
      %c0_88 = arith.constant 0 : index
      %196 = vector.load %arg22[%c0_86, %c0_87, %c0_88] : memref<4x8x8xf32, #tpu.memory_space<vmem>>, vector<4x8x8xf32>
      tpu.vector_store %arg22[%c0_86, %c0_87, %c0_88], %195 {strides = array<i32>} : memref<4x8x8xf32, #tpu.memory_space<vmem>>, vector<4x8x8xf32>,
    } else {
    }
    %c8_i32 = arith.constant 8 : i32
    %3 = arith.muli %arg1, %c8_i32 : i32
    %4 = tpu.assume_multiple %3, 8 : i32
    %c0 = arith.constant 0 : index
    %5 = arith.index_cast %4 : i32 to index
    %c0_1 = arith.constant 0 : index
    %6 = vector.load %arg2[%c0, %5, %c0_1] : memref<1x8x32xf32, #tpu.memory_space<vmem>>, vector<1x8x32xf32>
    %7 = vector.shape_cast %6 : vector<1x8x32xf32> to vector<8x32xf32>
    %c0_2 = arith.constant 0 : index
    %c0_3 = arith.constant 0 : index
    %c0_4 = arith.constant 0 : index
    %8 = vector.load %arg3[%c0_2, %c0_3, %c0_4] : memref<1x1x8xf32, #tpu.memory_space<vmem>>, vector<1x1x8xf32>
    %9 = vector.shape_cast %8 : vector<1x1x8xf32> to vector<1x8xf32>
    %c0_5 = arith.constant 0 : index
    %c0_6 = arith.constant 0 : index
    %10 = vector.load %arg4[%c0_5, %c0_6] : memref<1x32xf32, #tpu.memory_space<vmem>>, vector<1x32xf32>
    %c0_7 = arith.constant 0 : index
    %c0_8 = arith.constant 0 : index
    %11 = vector.load %arg5[%c0_7, %c0_8] : memref<1x32xf32, #tpu.memory_space<vmem>>, vector<1x32xf32>
    %cst = arith.constant dense<0.000000e+00> : vector<8xf32>
    %12 = vector.multi_reduction <add>, %7, %cst [1] : vector<8x32xf32> to vector<8xf32>
    %13 = vector.shape_cast %12 : vector<8xf32> to vector<8x1xf32>
    %cst_9 = arith.constant 3.200000e+01 : f32
    %14 = vector.broadcast %cst_9 : f32 to vector<8x1xf32>
    %15 = arith.divf %13, %14 : vector<8x1xf32>
    %16 = vector.broadcast %15 : vector<8x1xf32> to vector<8x32xf32>
    %17 = arith.subf %7, %16 : vector<8x32xf32>
    %18 = arith.mulf %17, %17 : vector<8x32xf32>
    %cst_10 = arith.constant dense<0.000000e+00> : vector<8xf32>
    %19 = vector.multi_reduction <add>, %18, %cst_10 [1] : vector<8x32xf32> to vector<8xf32>
    %20 = vector.shape_cast %19 : vector<8xf32> to vector<8x1xf32>
    %cst_11 = arith.constant 3.200000e+01 : f32
    %21 = vector.broadcast %cst_11 : f32 to vector<8x1xf32>
    %22 = arith.divf %20, %21 : vector<8x1xf32>
    %23 = vector.broadcast %15 : vector<8x1xf32> to vector<8x32xf32>
    %24 = arith.subf %7, %23 : vector<8x32xf32>
    %cst_12 = arith.constant 9.99999974E-6 : f32
    %25 = vector.broadcast %cst_12 : f32 to vector<8x1xf32>
    %26 = arith.addf %22, %25 : vector<8x1xf32>
    %27 = math.rsqrt %26 : vector<8x1xf32>
    %28 = vector.broadcast %27 : vector<8x1xf32> to vector<8x32xf32>
    %29 = arith.mulf %24, %28 : vector<8x32xf32>
    %30 = vector.broadcast %10 : vector<1x32xf32> to vector<8x32xf32>
    %31 = arith.mulf %29, %30 : vector<8x32xf32>
    %32 = vector.broadcast %11 : vector<1x32xf32> to vector<8x32xf32>
    %33 = arith.addf %31, %32 : vector<8x32xf32>
    %c0_13 = arith.constant 0 : index
    %c0_14 = arith.constant 0 : index
    %34 = vector.load %arg6[%c0_13, %c0_14] : memref<32x32xf32, #tpu.memory_space<vmem>>, vector<32x32xf32>
    %cst_15 = arith.constant dense<0.000000e+00> : vector<8x32xf32>
    %35 = tpu.matmul %33, %34, %cst_15 {dimension_numbers = #tpu.dot_dimension_numbers<[1], [0], [0], [1], [0, 0, 1, 1], [], []>} : vector<8x32xf32>, vector<32x32xf32>, vector<8x32xf32> -> vector<8x32xf32>
    %c0_16 = arith.constant 0 : index
    %c0_17 = arith.constant 0 : index
    %36 = vector.load %arg7[%c0_16, %c0_17] : memref<1x32xf32, #tpu.memory_space<vmem>>, vector<1x32xf32>
    %37 = vector.broadcast %36 : vector<1x32xf32> to vector<8x32xf32>
    %38 = arith.addf %35, %37 : vector<8x32xf32>
    %cst_18 = arith.constant 0.353553385 : f32
    %39 = vector.broadcast %cst_18 : f32 to vector<8x32xf32>
    %40 = arith.mulf %38, %39 : vector<8x32xf32>
    %41 = vector.extract_strided_slice %40 {offsets = [0, 0], sizes = [8, 8], strides = [1, 1]} : vector<8x32xf32> to vector<8x8xf32>
    %42 = vector.extract_strided_slice %40 {offsets = [0, 8], sizes = [8, 8], strides = [1, 1]} : vector<8x32xf32> to vector<8x8xf32>
    %43 = vector.extract_strided_slice %40 {offsets = [0, 16], sizes = [8, 8], strides = [1, 1]} : vector<8x32xf32> to vector<8x8xf32>
    %44 = vector.extract_strided_slice %40 {offsets = [0, 24], sizes = [8, 8], strides = [1, 1]} : vector<8x32xf32> to vector<8x8xf32>
    %45 = vector.shape_cast %41 : vector<8x8xf32> to vector<1x8x8xf32>
    %46 = vector.shape_cast %42 : vector<8x8xf32> to vector<1x8x8xf32>
    %47 = vector.shape_cast %43 : vector<8x8xf32> to vector<1x8x8xf32>
    %48 = vector.shape_cast %44 : vector<8x8xf32> to vector<1x8x8xf32>
    %49 = tpu.concatenate %45, %46, %47, %48 in 0 : vector<1x8x8xf32>, vector<1x8x8xf32>, vector<1x8x8xf32>, vector<1x8x8xf32> -> vector<4x8x8xf32>
    %c0_19 = arith.constant 0 : index
    %c0_20 = arith.constant 0 : index
    %c0_21 = arith.constant 0 : index
    %50 = vector.load %arg21[%c0_19, %c0_20, %c0_21] : memref<4x8x8xf32, #tpu.memory_space<vmem>>, vector<4x8x8xf32>
    "tpu.trace_start"() <{level = 10 : i32, message = "hqd,hkd->hqk"}> : () -> ()
    %cst_22 = arith.constant dense<0.000000e+00> : vector<4x8x8xf32>
    %51 = tpu.matmul %49, %50, %cst_22 {dimension_numbers = #tpu.dot_dimension_numbers<[2], [2], [1], [1], [0, 0, 0, 1, 1, 1], [0], [0]>} : vector<4x8x8xf32>, vector<4x8x8xf32>, vector<4x8x8xf32> -> vector<4x8x8xf32>
    "tpu.trace_stop"() : () -> ()
    %52 = vector.shape_cast %9 : vector<1x8xf32> to vector<1x1x8xf32>
    %53 = vector.broadcast %52 : vector<1x1x8xf32> to vector<4x8x8xf32>
    %54 = arith.addf %51, %53 : vector<4x8x8xf32>
    %cst_23 = arith.constant dense<0xFF800000> : vector<4x8xf32>
    %55 = vector.multi_reduction <maximumf>, %54, %cst_23 [2] : vector<4x8x8xf32> to vector<4x8xf32>
    %56 = vector.shape_cast %55 : vector<4x8xf32> to vector<4x8x1xf32>
    %57 = vector.broadcast %56 : vector<4x8x1xf32> to vector<4x8x8xf32>
    %58 = arith.subf %54, %57 : vector<4x8x8xf32>
    %59 = math.exp %58 : vector<4x8x8xf32>
    %cst_24 = arith.constant dense<0.000000e+00> : vector<4x8xf32>
    %60 = vector.multi_reduction <add>, %59, %cst_24 [2] : vector<4x8x8xf32> to vector<4x8xf32>
    %61 = vector.shape_cast %60 : vector<4x8xf32> to vector<4x8x1xf32>
    %62 = tpu.reciprocal %61 : vector<4x8x1xf32> -> vector<4x8x1xf32>
    %63 = vector.broadcast %62 : vector<4x8x1xf32> to vector<4x8x8xf32>
    %64 = arith.mulf %59, %63 : vector<4x8x8xf32>
    %c0_25 = arith.constant 0 : index
    %c0_26 = arith.constant 0 : index
    %c0_27 = arith.constant 0 : index
    %65 = vector.load %arg22[%c0_25, %c0_26, %c0_27] : memref<4x8x8xf32, #tpu.memory_space<vmem>>, vector<4x8x8xf32>
    "tpu.trace_start"() <{level = 10 : i32, message = "hqk,hkd->hqd"}> : () -> ()
    %cst_28 = arith.constant dense<0.000000e+00> : vector<4x8x8xf32>
    %66 = tpu.matmul %64, %65, %cst_28 {dimension_numbers = #tpu.dot_dimension_numbers<[2], [1], [1], [2], [0, 0, 0, 1, 1, 2], [0], [0]>} : vector<4x8x8xf32>, vector<4x8x8xf32>, vector<4x8x8xf32> -> vector<4x8x8xf32>
    "tpu.trace_stop"() : () -> ()
    %67 = vector.extract_strided_slice %66 {offsets = [0, 0, 0], sizes = [1, 8, 8], strides = [1, 1, 1]} : vector<4x8x8xf32> to vector<1x8x8xf32>
    %68 = vector.shape_cast %67 : vector<1x8x8xf32> to vector<8x8xf32>
    %69 = vector.extract_strided_slice %66 {offsets = [1, 0, 0], sizes = [1, 8, 8], strides = [1, 1, 1]} : vector<4x8x8xf32> to vector<1x8x8xf32>
    %70 = vector.shape_cast %69 : vector<1x8x8xf32> to vector<8x8xf32>
    %71 = vector.extract_strided_slice %66 {offsets = [2, 0, 0], sizes = [1, 8, 8], strides = [1, 1, 1]} : vector<4x8x8xf32> to vector<1x8x8xf32>
    %72 = vector.shape_cast %71 : vector<1x8x8xf32> to vector<8x8xf32>
    %73 = vector.extract_strided_slice %66 {offsets = [3, 0, 0], sizes = [1, 8, 8], strides = [1, 1, 1]} : vector<4x8x8xf32> to vector<1x8x8xf32>
    %74 = vector.shape_cast %73 : vector<1x8x8xf32> to vector<8x8xf32>
    %75 = tpu.concatenate %68, %70, %72, %74 in 1 : vector<8x8xf32>, vector<8x8xf32>, vector<8x8xf32>, vector<8x8xf32> -> vector<8x32xf32>
    %c0_29 = arith.constant 0 : index
    %c0_30 = arith.constant 0 : index
    %76 = vector.load %arg10[%c0_29, %c0_30] : memref<32x32xf32, #tpu.memory_space<vmem>>, vector<32x32xf32>
    %cst_31 = arith.constant dense<0.000000e+00> : vector<8x32xf32>
    %77 = tpu.matmul %75, %76, %cst_31 {dimension_numbers = #tpu.dot_dimension_numbers<[1], [0], [0], [1], [0, 0, 1, 1], [], []>} : vector<8x32xf32>, vector<32x32xf32>, vector<8x32xf32> -> vector<8x32xf32>
    %c0_32 = arith.constant 0 : index
    %c0_33 = arith.constant 0 : index
    %78 = vector.load %arg11[%c0_32, %c0_33] : memref<1x32xf32, #tpu.memory_space<vmem>>, vector<1x32xf32>
    %79 = vector.broadcast %78 : vector<1x32xf32> to vector<8x32xf32>
    %80 = arith.addf %77, %79 : vector<8x32xf32>
    %81 = arith.addf %7, %80 : vector<8x32xf32>
    %c0_34 = arith.constant 0 : index
    %c0_35 = arith.constant 0 : index
    %82 = vector.load %arg12[%c0_34, %c0_35] : memref<1x32xf32, #tpu.memory_space<vmem>>, vector<1x32xf32>
    %c0_36 = arith.constant 0 : index
    %c0_37 = arith.constant 0 : index
    %83 = vector.load %arg13[%c0_36, %c0_37] : memref<1x32xf32, #tpu.memory_space<vmem>>, vector<1x32xf32>
    %cst_38 = arith.constant dense<0.000000e+00> : vector<8xf32>
    %84 = vector.multi_reduction <add>, %81, %cst_38 [1] : vector<8x32xf32> to vector<8xf32>
    %85 = vector.shape_cast %84 : vector<8xf32> to vector<8x1xf32>
    %cst_39 = arith.constant 3.200000e+01 : f32
    %86 = vector.broadcast %cst_39 : f32 to vector<8x1xf32>
    %87 = arith.divf %85, %86 : vector<8x1xf32>
    %88 = vector.broadcast %87 : vector<8x1xf32> to vector<8x32xf32>
    %89 = arith.subf %81, %88 : vector<8x32xf32>
    %90 = arith.mulf %89, %89 : vector<8x32xf32>
    %cst_40 = arith.constant dense<0.000000e+00> : vector<8xf32>
    %91 = vector.multi_reduction <add>, %90, %cst_40 [1] : vector<8x32xf32> to vector<8xf32>
    %92 = vector.shape_cast %91 : vector<8xf32> to vector<8x1xf32>
    %cst_41 = arith.constant 3.200000e+01 : f32
    %93 = vector.broadcast %cst_41 : f32 to vector<8x1xf32>
    %94 = arith.divf %92, %93 : vector<8x1xf32>
    %95 = vector.broadcast %87 : vector<8x1xf32> to vector<8x32xf32>
    %96 = arith.subf %81, %95 : vector<8x32xf32>
    %cst_42 = arith.constant 9.99999974E-6 : f32
    %97 = vector.broadcast %cst_42 : f32 to vector<8x1xf32>
    %98 = arith.addf %94, %97 : vector<8x1xf32>
    %99 = math.rsqrt %98 : vector<8x1xf32>
    %100 = vector.broadcast %99 : vector<8x1xf32> to vector<8x32xf32>
    %101 = arith.mulf %96, %100 : vector<8x32xf32>
    %102 = vector.broadcast %82 : vector<1x32xf32> to vector<8x32xf32>
    %103 = arith.mulf %101, %102 : vector<8x32xf32>
    %104 = vector.broadcast %83 : vector<1x32xf32> to vector<8x32xf32>
    %105 = arith.addf %103, %104 : vector<8x32xf32>
    %c0_43 = arith.constant 0 : index
    %c0_44 = arith.constant 0 : index
    %106 = vector.load %arg14[%c0_43, %c0_44] : memref<32x64xf32, #tpu.memory_space<vmem>>, vector<32x64xf32>
    %cst_45 = arith.constant dense<0.000000e+00> : vector<8x64xf32>
    %107 = tpu.matmul %105, %106, %cst_45 {dimension_numbers = #tpu.dot_dimension_numbers<[1], [0], [0], [1], [0, 0, 1, 1], [], []>} : vector<8x32xf32>, vector<32x64xf32>, vector<8x64xf32> -> vector<8x64xf32>
    %c0_46 = arith.constant 0 : index
    %c0_47 = arith.constant 0 : index
    %108 = vector.load %arg15[%c0_46, %c0_47] : memref<1x64xf32, #tpu.memory_space<vmem>>, vector<1x64xf32>
    %109 = vector.broadcast %108 : vector<1x64xf32> to vector<8x64xf32>
    %110 = arith.addf %107, %109 : vector<8x64xf32>
    %cst_48 = arith.constant 0.000000e+00 : f32
    %111 = vector.broadcast %cst_48 : f32 to vector<8x64xf32>
    %112 = arith.maximumf %110, %111 : vector<8x64xf32>
    %c0_49 = arith.constant 0 : index
    %c0_50 = arith.constant 0 : index
    %113 = vector.load %arg16[%c0_49, %c0_50] : memref<64x32xf32, #tpu.memory_space<vmem>>, vector<64x32xf32>
    %cst_51 = arith.constant dense<0.000000e+00> : vector<8x32xf32>
    %114 = tpu.matmul %112, %113, %cst_51 {dimension_numbers = #tpu.dot_dimension_numbers<[1], [0], [0], [1], [0, 0, 1, 1], [], []>} : vector<8x64xf32>, vector<64x32xf32>, vector<8x32xf32> -> vector<8x32xf32>
    %c0_52 = arith.constant 0 : index
    %c0_53 = arith.constant 0 : index
    %115 = vector.load %arg17[%c0_52, %c0_53] : memref<1x32xf32, #tpu.memory_space<vmem>>, vector<1x32xf32>
    %116 = vector.broadcast %115 : vector<1x32xf32> to vector<8x32xf32>
    %117 = arith.addf %114, %116 : vector<8x32xf32>
    %118 = arith.addf %81, %117 : vector<8x32xf32>
    %c0_54 = arith.constant 0 : index
    %c0_55 = arith.constant 0 : index
    %119 = vector.load %arg18[%c0_54, %c0_55] : memref<1x32xf32, #tpu.memory_space<vmem>>, vector<1x32xf32>
    %c0_56 = arith.constant 0 : index
    %c0_57 = arith.constant 0 : index
    %120 = vector.load %arg19[%c0_56, %c0_57] : memref<1x32xf32, #tpu.memory_space<vmem>>, vector<1x32xf32>
    %cst_58 = arith.constant dense<0.000000e+00> : vector<8xf32>
    %121 = vector.multi_reduction <add>, %118, %cst_58 [1] : vector<8x32xf32> to vector<8xf32>
    %122 = vector.shape_cast %121 : vector<8xf32> to vector<8x1xf32>
    %cst_59 = arith.constant 3.200000e+01 : f32
    %123 = vector.broadcast %cst_59 : f32 to vector<8x1xf32>
    %124 = arith.divf %122, %123 : vector<8x1xf32>
    %125 = vector.broadcast %124 : vector<8x1xf32> to vector<8x32xf32>
    %126 = arith.subf %118, %125 : vector<8x32xf32>
    %127 = arith.mulf %126, %126 : vector<8x32xf32>
    %cst_60 = arith.constant dense<0.000000e+00> : vector<8xf32>
    %128 = vector.multi_reduction <add>, %127, %cst_60 [1] : vector<8x32xf32> to vector<8xf32>
    %129 = vector.shape_cast %128 : vector<8xf32> to vector<8x1xf32>
    %cst_61 = arith.constant 3.200000e+01 : f32
    %130 = vector.broadcast %cst_61 : f32 to vector<8x1xf32>
    %131 = arith.divf %129, %130 : vector<8x1xf32>
    %132 = vector.broadcast %124 : vector<8x1xf32> to vector<8x32xf32>
    %133 = arith.subf %118, %132 : vector<8x32xf32>
    %cst_62 = arith.constant 9.99999974E-6 : f32
    %134 = vector.broadcast %cst_62 : f32 to vector<8x1xf32>
    %135 = arith.addf %131, %134 : vector<8x1xf32>
    %136 = math.rsqrt %135 : vector<8x1xf32>
    %137 = vector.broadcast %136 : vector<8x1xf32> to vector<8x32xf32>
    %138 = arith.mulf %133, %137 : vector<8x32xf32>
    %139 = vector.broadcast %119 : vector<1x32xf32> to vector<8x32xf32>
    %140 = arith.mulf %138, %139 : vector<8x32xf32>
    %141 = vector.broadcast %120 : vector<1x32xf32> to vector<8x32xf32>
    %142 = arith.addf %140, %141 : vector<8x32xf32>
    %c0_63 = arith.constant 0 : index
    %c0_64 = arith.constant 0 : index
    %c0_65 = arith.constant 0 : index
    %143 = vector.load %arg20[%c0_63, %c0_64, %c0_65] : memref<1x8x32xf32, #tpu.memory_space<vmem>>, vector<1x8x32xf32>
    %144 = vector.shape_cast %143 : vector<1x8x32xf32> to vector<8x32xf32>
    %145 = vector.shape_cast %142 : vector<8x32xf32> to vector<1x8x32xf32>
    tpu.vector_store %arg20[%c0_63, %c0_64, %c0_65], %145 {strides = array<i32>} : memref<1x8x32xf32, #tpu.memory_space<vmem>>, vector<1x8x32xf32>,
    return
  }
  func.func @transform_0(%arg0: i32, %arg1: i32) -> (i32, i32, i32) {
    %c0_i32 = arith.constant 0 : i32
    %c0_i32_0 = arith.constant 0 : i32
    %c0_i32_1 = arith.constant 0 : i32
    return %arg0, %c0_i32, %c0_i32_0 : i32, i32, i32
  }
  func.func @transform_1(%arg0: i32, %arg1: i32) -> (i32, i32, i32) {
    %c0_i32 = arith.constant 0 : i32
    %c0_i32_0 = arith.constant 0 : i32
    %c0_i32_1 = arith.constant 0 : i32
    return %arg0, %c0_i32, %c0_i32_0 : i32, i32, i32
  }
  func.func @transform_2(%arg0: i32, %arg1: i32) -> (i32, i32) {
    %c0_i32 = arith.constant 0 : i32
    %c0_i32_0 = arith.constant 0 : i32
    %c0_i32_1 = arith.constant 0 : i32
    return %c0_i32, %c0_i32_0 : i32, i32
  }
  func.func @transform_3(%arg0: i32, %arg1: i32) -> (i32, i32) {
    %c0_i32 = arith.constant 0 : i32
    %c0_i32_0 = arith.constant 0 : i32
    %c0_i32_1 = arith.constant 0 : i32
    return %c0_i32, %c0_i32_0 : i32, i32
  }
  func.func @transform_4(%arg0: i32, %arg1: i32) -> (i32, i32) {
    %c0_i32 = arith.constant 0 : i32
    %c0_i32_0 = arith.constant 0 : i32
    %c0_i32_1 = arith.constant 0 : i32
    return %c0_i32, %c0_i32_0 : i32, i32
  }
  func.func @transform_5(%arg0: i32, %arg1: i32) -> (i32, i32) {
    %c0_i32 = arith.constant 0 : i32
    %c0_i32_0 = arith.constant 0 : i32
    %c0_i32_1 = arith.constant 0 : i32
    return %c0_i32, %c0_i32_0 : i32, i32
  }
  func.func @transform_6(%arg0: i32, %arg1: i32) -> (i32, i32) {
    %c0_i32 = arith.constant 0 : i32
    %c0_i32_0 = arith.constant 0 : i32
    %c0_i32_1 = arith.constant 0 : i32
    return %c0_i32, %c0_i32_0 : i32, i32
  }
  func.func @transform_7(%arg0: i32, %arg1: i32) -> (i32, i32) {
    %c0_i32 = arith.constant 0 : i32
    %c0_i32_0 = arith.constant 0 : i32
    %c0_i32_1 = arith.constant 0 : i32
    return %c0_i32, %c0_i32_0 : i32, i32
  }
  func.func @transform_8(%arg0: i32, %arg1: i32) -> (i32, i32) {
    %c0_i32 = arith.constant 0 : i32
    %c0_i32_0 = arith.constant 0 : i32
    %c0_i32_1 = arith.constant 0 : i32
    return %c0_i32, %c0_i32_0 : i32, i32
  }
  func.func @transform_9(%arg0: i32, %arg1: i32) -> (i32, i32) {
    %c0_i32 = arith.constant 0 : i32
    %c0_i32_0 = arith.constant 0 : i32
    %c0_i32_1 = arith.constant 0 : i32
    return %c0_i32, %c0_i32_0 : i32, i32
  }
  func.func @transform_10(%arg0: i32, %arg1: i32) -> (i32, i32) {
    %c0_i32 = arith.constant 0 : i32
    %c0_i32_0 = arith.constant 0 : i32
    %c0_i32_1 = arith.constant 0 : i32
    return %c0_i32, %c0_i32_0 : i32, i32
  }
  func.func @transform_11(%arg0: i32, %arg1: i32) -> (i32, i32) {
    %c0_i32 = arith.constant 0 : i32
    %c0_i32_0 = arith.constant 0 : i32
    %c0_i32_1 = arith.constant 0 : i32
    return %c0_i32, %c0_i32_0 : i32, i32
  }
  func.func @transform_12(%arg0: i32, %arg1: i32) -> (i32, i32) {
    %c0_i32 = arith.constant 0 : i32
    %c0_i32_0 = arith.constant 0 : i32
    %c0_i32_1 = arith.constant 0 : i32
    return %c0_i32, %c0_i32_0 : i32, i32
  }
  func.func @transform_13(%arg0: i32, %arg1: i32) -> (i32, i32) {
    %c0_i32 = arith.constant 0 : i32
    %c0_i32_0 = arith.constant 0 : i32
    %c0_i32_1 = arith.constant 0 : i32
    return %c0_i32, %c0_i32_0 : i32, i32
  }
  func.func @transform_14(%arg0: i32, %arg1: i32) -> (i32, i32) {
    %c0_i32 = arith.constant 0 : i32
    %c0_i32_0 = arith.constant 0 : i32
    %c0_i32_1 = arith.constant 0 : i32
    return %c0_i32, %c0_i32_0 : i32, i32
  }
  func.func @transform_15(%arg0: i32, %arg1: i32) -> (i32, i32) {
    %c0_i32 = arith.constant 0 : i32
    %c0_i32_0 = arith.constant 0 : i32
    %c0_i32_1 = arith.constant 0 : i32
    return %c0_i32, %c0_i32_0 : i32, i32
  }
  func.func @transform_16(%arg0: i32, %arg1: i32) -> (i32, i32) {
    %c0_i32 = arith.constant 0 : i32
    %c0_i32_0 = arith.constant 0 : i32
    %c0_i32_1 = arith.constant 0 : i32
    return %c0_i32, %c0_i32_0 : i32, i32
  }
  func.func @transform_17(%arg0: i32, %arg1: i32) -> (i32, i32) {
    %c0_i32 = arith.constant 0 : i32
    %c0_i32_0 = arith.constant 0 : i32
    %c0_i32_1 = arith.constant 0 : i32
    return %c0_i32, %c0_i32_0 : i32, i32
  }
  func.func @transform_18(%arg0: i32, %arg1: i32) -> (i32, i32, i32) {
    %c0_i32 = arith.constant 0 : i32
    %c0_i32_0 = arith.constant 0 : i32
    return %arg0, %arg1, %c0_i32 : i32, i32, i32
  }
}

</mosaic_0001>

<bundles_post_ra>
// kernel: tpu_custom_call.1
= control target key start
LH: loop header
LB: loop body
LE: loop exit
PB: predicated region body
PF: predicated region fallthrough
CT: control target
= control target key end

     0   :  { %s3043_s0 = inlined_call_operand.hbm [shape: f32[2,8,32], index: 0, kind: input, shape index: {}]   ;;  %s3044_s1 = inlined_call_operand.hbm [shape: f32[2,1,8], index: 1, kind: input, shape index: {}]   ;;  %s3045_s2 = inlined_call_operand.vmem [shape: f32[1,32], index: 2, kind: input, shape index: {}]   ;;  %s3046_s3 = inlined_call_operand.vmem [shape: f32[1,32], index: 3, kind: input, shape index: {}]   ;;  %s3047_s4 = inlined_call_operand.vmem [shape: f32[32,32], index: 4, kind: input, shape index: {}]   ;;  %s3048_s5 = inlined_call_operand.vmem [shape: f32[1,32], index: 5, kind: input, shape index: {}]   ;;  %s3049_s6 = inlined_call_operand.vmem [shape: f32[32,64], index: 6, kind: input, shape index: {}]   ;;  %s3050_s7 = inlined_call_operand.vmem [shape: f32[1,64], index: 7, kind: input, shape index: {}]   ;;  %s3051_s8 = inlined_call_operand.vmem [shape: f32[32,32], index: 8, kind: input, shape index: {}]   ;;  %s3052_s9 = inlined_call_operand.vmem [shape: f32[1,32], index: 9, kind: input, shape index: {}]   ;;  %s3053_s10 = inlined_call_operand.vmem [shape: f32[1,32], index: 10, kind: input, shape index: {}]   ;;  %s3054_s11 = inlined_call_operand.vmem [shape: f32[1,32], index: 11, kind: input, shape index: {}]   ;;  %s3055_s12 = inlined_call_operand.hbm [shape: f32[32,64], index: 12, kind: input, shape index: {}]   ;;  %s3056_s13 = inlined_call_operand.vmem [shape: f32[1,64], index: 13, kind: input, shape index: {}]   ;;  %s3057_s14 = inlined_call_operand.vmem [shape: f32[64,32], index: 14, kind: input, shape index: {}]   ;;  %s3058_s15 = inlined_call_operand.vmem [shape: f32[1,32], index: 15, kind: input, shape index: {}]   ;;  %s3059_s16 = inlined_call_operand.vmem [shape: f32[1,32], index: 16, kind: input, shape index: {}]   ;;  %s3060_s17 = inlined_call_operand.vmem [shape: f32[1,32], index: 17, kind: input, shape index: {}]   ;;  %s3061_s18 = inlined_call_operand.hbm [shape: f32[2,8,32], index: 18, kind: output, shape index: {}]  }
   0x1   :  { %3071 = sst [smem:[#allocation23_spill]] %s3043_s0 }
   0x2   :  { %3072 = sst [smem:[#allocation24_spill]] %s3044_s1 }
   0x3   :  { %3073 = sst [smem:[#allocation25_spill]] %s3045_s2 }
   0x4   :  { %3074 = sst [smem:[#allocation26_spill]] %s3053_s10 }
   0x5   :  { %3075 = sst [smem:[#allocation27_spill]] %s3054_s11 }
   0x6   :  { %3076 = sst [smem:[#allocation28_spill]] %s3055_s12 }
   0x7   :  { %3077 = sst [smem:[#allocation29_spill]] %s3056_s13 }
   0x8   :  { %3078 = sst [smem:[#allocation30_spill]] %s3058_s15 }
   0x9   :  { %3079 = sst [smem:[#allocation31_spill]] %s3059_s16 }
   0xa   :  { %3080 = sst [smem:[#allocation32_spill]] %s3060_s17 }
   0xb   :  { %3081 = sst [smem:[#allocation33_spill]] %s3061_s18 }
   0xc   :  { %23 = vsyncpa [#allocation5], 0 }
   0xd   :  { %25 = vsyncpa [#allocation5 + $0x1], 0 }
   0xe   :  { %26 = vsyncpa [#allocation8], 0 }
   0xf   :  { %28 = vsyncpa [#allocation8 + $0x1], 0 }
  0x10   :  { %29 = vsyncpa [#allocation6], 0 }
  0x11   :  { %31 = vsyncpa [#allocation6 + $0x1], 0  ;;  %s2633_s27 = smov 0   ;;  %s2635_s28 = smov 0  }
  0x12   :  { %s2637_s29 = smov 0   ;;  %s2639_s30 = smov 0  }
  0x13   :  { %s2641_s0 = smov 0   ;;  %s2643_s19 = smov 0  }
  0x14 LB: > { %3082 = sst [smem:[#allocation15_spill]] %s2501_s27  ;;  %s2664_s1 = sadd.s32 4294967295, %s2521_s19   ;;  %s2521_s19 = sphi %s2643_s19, %s37_s19   ;;  %s2517_s0 = sphi %s2641_s0, %s3121_s0   ;;  %s2513_s30 = sphi %s2639_s30, %s3120_s30   ;;  %s2509_s29 = sphi %s2637_s29, %s3116_s29   ;;  %s2505_s28 = sphi %s2635_s28, %s3119_s28   ;;  %s2501_s27 = sphi %s2633_s27, %s3118_s27  }
  0x15   : > { %3083 = sst [smem:[#allocation16_spill]] %s2509_s29  ;;  %s2044_s20 = sadd.s32 4294967294, %s2521_s19  }
  0x16   : > { %3084 = sst [smem:[#allocation17_spill]] %s2513_s30  ;;  %p69_p0 = scmp.ne.s32.totalorder %s2505_s28, %s2501_s27 }
  0x17   : > { %3085 = sst [smem:[#allocation18_spill]] %s2521_s19  ;;  %p70_p1 = scmp.eq.s32.totalorder %s2664_s1, 0 }
  0x18   : > { %p463_p3 = scmp.eq.s32.totalorder %s2044_s20, 1  ;;  %p2045_p5 = scmp.ge.s32.totalorder %s2521_s19, 1 }
  0x19   : > { %p2673_p4 = por %p70_p1, %p69_p0  ;;  %p470_p7 = scmp.lt.s32.totalorder %s2521_s19, 3 }
  0x1a   : > { %p2678_p6 = por %p463_p3, %p69_p0  ;;  %s2523_s23 = smov [#allocation9]  }
  0x1b   : > { %p2683_p8 = pnand %p2045_p5, %p470_p7  ;;  %s512_s24 = sshll.u32 %s2523_s23, 4  ;;  %s513_s24 = int_to_ptr.vmem [resolvable:$true] %s512_s24 }
  0x1c   : > { %s3087_s22 = scalar_select %p2678_p6, 1, 0 }
  0x1d   : > { %p2248_p9 = pneg %p2683_p8  ;;  %p2047_p10 = scmp.ge.s32.totalorder %s2521_s19, 2 }
  0x1e   : > { %3088 = sst [smem:[#allocation19_spill]] %s3087_s22  ;;  %s49_s26 = sadd.s32 1, %s2517_s0 }
  0x1f   : > { %p2692_p11 = pnand %p2248_p9, %p70_p1  ;;  %s2362_s20 = scalar_lea.vmem %s513_s24, 512 }
  0x20   : > { %p2363_p13 = scmp.ne.s32.totalorder %s513_s24, %s2362_s20  ;;  %p2370_p5 = scmp.lt.s32.totalorder %s513_s24, %s513_s24 }
  0x21   : > { %p2353_p12 = pneg %p2692_p11  ;;  %p2371_p7 = scmp.lt.s32.totalorder %s2362_s20, %s2362_s20 }
  0x23   : > { %p2365_p0 = pnand %p2363_p13, %p2353_p12  ;;  %p2372_p2 = por %p2371_p7, %p2370_p5 }
  0x25   : > { %p2366_p3 = pneg %p2365_p0 }
  0x27   : > { %p2373_p6 = pnand %p2372_p2, %p2366_p3 }
  0x29   : > { %2376 = shalt.err (!%p2373_p6)
}
  0x2a   : > { %s2524_s23 = smov 128   ;;  %s2525_s22 = smov 8  }
  0x2b   : > { %s3091_s12 = sld [smem:[#allocation28_spill]]  ;;  %p51_p2 = scmp.ge.s32.totalorder %s49_s26, 2 }
  0x2c   : > { %s56_s20 = sadd.s32 1, %s2509_s29  ;;  %p63_p6 = scmp.ne.s32.totalorder %s2509_s29, %s2505_s28 }
  0x2d   : > { %p64_p9 = scmp.eq.s32.totalorder %s2521_s19, 0  ;;  %s3123_s26 = smov (%p51_p2, %s49_s26), 0 }
  0x2e   : > { %3092 = sst [smem:[#allocation20_spill]] %s3123_s26  ;;  %p3094_p13 = scmp.eq.s32.totalorder %s2664_s1, 1 }
  0x2f   : > { %p2710_p12 = por %p64_p9, %p63_p6  ;;  %s53_s18 = ssub.s32 %s2517_s0, %s3123_s26 }
  0x30   : > { %p2716_p0 = por %p3094_p13, %p63_p6  ;;  %p54_p3 = scmp.eq.s32.totalorder %s53_s18, 0 }
  0x31   : > { %2251 = dma.hbm_to_vmem [thread:$0]  (!%p2692_p11), %s3091_s12, 512, %s513_s24, [#allocation8], %s2524_s23, %s2524_s23, %s2525_s22  }
  0x32   : > { %s3095_s25 = scalar_select %p2716_p0, 1, 0 }
  0x33   : > { %p2264_p11 = scmp.lt.s32.totalorder %s2521_s19, 2  ;;  %s541_s27 = sand.u32 1, %s2509_s29  }
  0x34   : > { %3096 = sst [smem:[#allocation21_spill]] %s3095_s25  ;;  %s2048_s22 = sshll.u32 %s541_s27, 3 }
  0x35   : > { %s2725_s24 = scalar_select %p54_p3, %s2509_s29, %s56_s20  }
  0x36   : > { %s2049_s23 = sshll.u32 %s2517_s0, 7  ;;  %s3098_s30 = sld [smem:[#allocation23_spill]] }
  0x37   : > { %3097 = sst [smem:[#allocation22_spill]] %s2725_s24  ;;  %s545_s13 = scalar_lea.vmem [#allocation4], %s2048_s22 }
  0x38   : > { %s552_s11 = sshll.u32 %s545_s13, 4  ;;  %p2733_p5 = pnand %p2264_p11, %p2710_p12  ;;  %s553_s11 = int_to_ptr.vmem [resolvable:$true] %s552_s11 }
  0x39   : > { %s559_s18 = sand.u32 1, %s2521_s19   ;;  %s542_s26 = scalar_lea.sflag [#allocation5], %s541_s27 }
  0x3a   : > { %p2379_p7 = pneg %p2733_p5  ;;  %s2390_s20 = scalar_lea.vmem %s553_s11, 128 }
  0x3b   : > { %p2391_p2 = scmp.ne.s32.totalorder %s553_s11, %s2390_s20  ;;  %s2526_s12 = smov [#allocation4]  }
  0x3c   : > { %s550_s15 = scalar_lea.hbm %s3098_s30, %s2049_s23  ;;  %s2395_s13 = sshll.u32 %s2526_s12, 4  ;;  %s2396_s13 = int_to_ptr.vmem [resolvable:$false] %s2395_s13 }
  0x3d   : > { %p2393_p6 = pnand %p2391_p2, %p2379_p7  ;;  %s2397_s16 = scalar_lea.vmem %s2396_s13, 256 }
  0x3e   : > { %p2398_p12 = scmp.lt.s32.totalorder %s553_s11, %s2396_s13  ;;  %p2399_p13 = scmp.lt.s32.totalorder %s2397_s16, %s2390_s20 }
  0x3f   : > { %p2394_p9 = pneg %p2393_p6 }
  0x40   : > { %p2400_p11 = por %p2399_p13, %p2398_p12 }
  0x42   : > { %p2401_p3 = pnand %p2400_p11, %p2394_p9 }
  0x44   : > { %2404 = shalt.err (!%p2401_p3)
}
  0x45   : > { %2255 = dma.hbm_to_vmem [thread:$0]  (!%p2733_p5), %s550_s15, 128, %s553_s11, %s542_s26  }
  0x46   : > { %s2050_s17 = sshll.u32 %s2517_s0, 4  ;;  %s562_s30 = scalar_lea.vmem [#allocation7], %s541_s27 }
  0x47   : > { %s569_s22 = sshll.u32 %s562_s30, 4  ;;  %s3100_s29 = sld [smem:[#allocation24_spill]]  ;;  %s570_s22 = int_to_ptr.vmem [resolvable:$true] %s569_s22 }
  0x48   : > { %s560_s12 = scalar_lea.sflag [#allocation8], %s559_s18  ;;  %s2418_s25 = scalar_lea.vmem %s570_s22, 16 }
  0x49   : > { %p2419_p2 = scmp.ne.s32.totalorder %s570_s22, %s2418_s25  ;;  %s2527_s20 = smov [#allocation7]  }
  0x4a   : > { %s2423_s13 = sshll.u32 %s2527_s20, 4  ;;  %s2424_s13 = int_to_ptr.vmem [resolvable:$false] %s2423_s13 }
  0x4b   : > { %p2421_p6 = pnand %p2419_p2, %p2379_p7  ;;  %s2425_s16 = scalar_lea.vmem %s2424_s13, 32 }
  0x4c   : > { %p2426_p12 = scmp.lt.s32.totalorder %s570_s22, %s2424_s13  ;;  %p2427_p13 = scmp.lt.s32.totalorder %s2425_s16, %s2418_s25 }
  0x4d   : > { %s567_s19 = scalar_lea.hbm %s3100_s29, %s2050_s17  ;;  %p2422_p9 = pneg %p2421_p6 }
  0x4e   : > { %p2428_p11 = por %p2427_p13, %p2426_p12 }
  0x50   : > { %p2429_p3 = pnand %p2428_p11, %p2422_p9 }
  0x52   : > { %2432 = shalt.err (!%p2429_p3)
}
  0x53   : > { %2258 = dma.hbm_to_vmem [thread:$0]  (!%p2733_p5), %s567_s19, 16, %s570_s22, %s560_s12  }
  0x54   : > { %578 = sbr.rel (%p2683_p8) target bundleno = 2818 (0xb02), region = 92  ;;  %s2757_s11 = sand.u32 (!%p2683_p8), 1, %s2505_s28  }
  0x55   : > { %s2052_s15 = sshll.u32 (!%p2683_p8), %s2757_s11, 3  ;;  %s581_s29 = scalar_lea.sflag (!%p2683_p8), [#allocation5], %s2757_s11 }
  0x56   : > { %s584_s26 = scalar_lea.vmem (!%p2683_p8), [#allocation4], %s2052_s15 }
  0x59   : > { %2484 = dma.done.wait (%p2673_p4), %s581_s29, 128  }
  0x5a   : > { %2486 = vsyncadd (%p2673_p4), %s581_s29, 4294967168  ;;  %s589_s10 = sand.u32 1, %s2664_s1   ;;  %s592_s2 = scalar_lea.vmem [#allocation7], %s2757_s11 }
  0x5b   : > { %s590_s19 = scalar_lea.sflag [#allocation8], %s589_s10 }
  0x5c   : > { %2488 = dma.done.wait (%p2673_p4), %s590_s19, 16  }
  0x5d   : > { %2490 = vsyncadd (%p2673_p4), %s590_s19, 4294967280 }
  0x5e   : > { %2492 = dma.done.wait (%p70_p1), [#allocation8], 512  }
  0x5f   : > { %2494 = vsyncadd (%p70_p1), [#allocation8], 4294966784  ;;  %vm660_vm0 = vcmask 261120   ;;  %v2777_v0 = vld [vmem:[%s584_s26] sm:$0xff]  ;;  %v2528_v12 = vmov 0.0   ;;  %v692_v13 = vld [vmem:[%s3049_s6 + $0x18] sm:$0xff] }
  0x60   : > { %v661_v1 = vsel %vm660_vm0, %v2777_v0, 0.0  ;;  %2135 = vmatprep.subr.mxu1 %v2528_v12  ;;  %2157 = vmatprep.subr.mxu0 %v2528_v12  ;;  %v691_v14 = vld [vmem:[%s3049_s6 + $0x10] sm:$0xff]  ;;  %v690_v15 = vld [vmem:[%s3049_s6 + $0x8] sm:$0xff]  ;;  %v689_v16 = vld [vmem:[%s3049_s6] sm:$0xff]  ;;  %vm2529_vm1 = vmmov 0   ;;  %s3101_s12 = sld [smem:[#allocation25_spill]] }
  0x61   : > { %662 = vadd.xlane.f32.xlu0 %v661_v1  ;;  %2136 = vmatpush3.msra.mxu1 %v692_v13  ;;  %v2056_v26 = vld [vmem:[%s3046_s3] ss:$0 sm:$0xff]  ;;  %v842_v31 = vld [vmem:[%s3047_s4 + $0x18] sm:$0xff]  ;;  %v841_v32 = vld [vmem:[%s3047_s4 + $0x10] sm:$0xff]  ;;  %vm783_vm2 = vcmask 64512   ;;  %s2530_s18 = smov 120  }
  0x62   : > { %2137 = vmatprep.subr.mxu1 %v2528_v12  ;;  %2143 = vmatprep.mubr.msk.f32.mxu1 %vm2529_vm1, %v2528_v12  ;;  %v840_v33 = vld [vmem:[%s3047_s4 + $0x8] sm:$0xff]  ;;  %v839_v35 = vld [vmem:[%s3047_s4] sm:$0xff]  ;;  %s2531_s17 = smov 112   ;;  %s2532_s23 = smov 104   ;;  %vm1595_vm3 = vcmask 130048   ;;  %vm1597_vm4 = vcmask 195584  }
  0x63   : > { %2138 = vmatpush3.msra.mxu1 %v691_v14  ;;  %2159 = vmatprep.mubr.msk.f32.mxu0 %vm2529_vm1, %v2528_v12  ;;  %v2057_v37 = vld [vmem:[%s3050_s7] ss:$0 sm:$0xff]  ;;  %s2534_s10 = smov 8   ;;  %s2535_s19 = smov 16   ;;  %vm1813_vm5 = vcmask 523264  }
  0x64   : > { %2139 = vmatprep.subr.mxu1 %v2528_v12  ;;  %v2061_v41 = vld [vmem:[%s3048_s5] ss:$0 sm:$0xff]  ;;  %s2536_s25 = smov 24   ;;  %s3103_s21 = sld [smem:[#allocation27_spill]] }
  0x65   : > { %812 = vadd.xlane.f32.xlu0 %v661_v1  ;;  %2140 = vmatpush3.msra.mxu1 %v690_v15  ;;  %v2063_v56 = vld [vmem:[%s592_s2] ss:$0 sm:$0xff]  ;;  %s2533_s2 = smov 96   ;;  %s3105_s13 = sld [smem:[#allocation30_spill]] }
  0x66   : > { %2141 = vmatprep.subr.mxu1 %v2528_v12  ;;  %v2055_v24 = vld [vmem:[%s3101_s12] ss:$0 sm:$0xff]  ;;  %s3106_s16 = sld [smem:[#allocation17_spill]]  ;;  %s652_s24 = scalar_lea.vmem [#allocation10], %s2052_s15 }
  0x67   : > { %2142 = vmatpush3.msra.mxu1 %v689_v16  ;;  %s3110_s22 = sld [smem:[#allocation33_spill]]  ;;  %s2537_s20 = smov [#allocation10]  }
  0x68   : > { %2146 = vmatprep.subr.mxu1 %v2528_v12 }
  0x6c   : > { %s2087_s27 = sshll.u32 %s3106_s16, 7 }
  0xea   : > { %v663_v2 = vpop.xlane.xlu0 %662 }
  0xeb   : > { %v665_v3 = vmul.f32 0.03125, %v663_v2 }
  0xed   : > { %v666_v4 = vsub.f32 %v2777_v0, %v665_v3 }
  0xee   : > { %v813_v5 = vpop.xlane.xlu0 %812 }
  0xef   : > { %v815_v6 = vmul.f32 0.03125, %v813_v5  ;;  %v667_v7 = vmul.f32 %v666_v4, %v666_v4 }
  0xf1   : > { %v816_v8 = vsub.f32 %v2777_v0, %v815_v6  ;;  %v668_v9 = vsel %vm660_vm0, %v667_v7, 0.0 }
  0xf2   : > { %669 = vadd.xlane.f32.xlu1 %v668_v9 }
  0xf3   : > { %v817_v10 = vmul.f32 %v816_v8, %v816_v8 }
  0xf5   : > { %v818_v11 = vsel %vm660_vm0, %v817_v10, 0.0 }
  0xf6   : > { %819 = vadd.xlane.f32.xlu1 %v818_v11 }
 0x17b   : > { %v670_v17 = vpop.xlane.xlu1 %669 }
 0x17c   : > { %v671_v18 = vmul.f32 0.03125, %v670_v17 }
 0x17e   : > { %v672_v19 = vadd.f32 1e-05, %v671_v18 }
 0x17f   : > { %v820_v20 = vpop.xlane.xlu1 %819 }
 0x180   : > { %2327 = vrsqrt.f32 %v672_v19  ;;  %v821_v21 = vmul.f32 0.03125, %v820_v20 }
 0x182   : > { %v822_v22 = vadd.f32 1e-05, %v821_v21 }
 0x184   : > { %2329 = vrsqrt.f32 %v822_v22 }
 0x18d   : > { %v2328_v23 = vpop.eup %2327 }
 0x18e   : > { %v674_v25 = vmul.f32 %v2328_v23, %v666_v4 }
 0x190   : > { %v681_v27 = vmul.f32 %v2055_v24, %v674_v25 }
 0x191   : > { %v2330_v28 = vpop.eup %2329 }
 0x192   : > { %v824_v29 = vmul.f32 %v2330_v28, %v816_v8  ;;  %v688_v30 = vadd.f32 %v2056_v26, %v681_v27 }
 0x194   : > { %2144 = vmatmul.mubr.msk.f32.vlgmr.msra.gmra.mxu1 %vm660_vm0, %v688_v30  ;;  %v831_v34 = vmul.f32 %v2055_v24, %v824_v29 }
 0x195   : > { %2147 = vmatpush3.msra.mxu1 %v842_v31  ;;  %2154 = vmatprep.mubr.msk.f32.mxu1 %vm2529_vm1, %v2528_v12 }
 0x196   : > { %2148 = vmatprep.subr.mxu1 %v2528_v12  ;;  %v838_v36 = vadd.f32 %v2056_v26, %v831_v34 }
 0x197   : > { %2149 = vmatpush3.msra.mxu1 %v841_v32 }
 0x198   : > { %2150 = vmatprep.subr.mxu1 %v2528_v12 }
 0x199   : > { %2151 = vmatpush3.msra.mxu1 %v840_v33 }
 0x19a   : > { %2152 = vmatprep.subr.mxu1 %v2528_v12 }
 0x19b   : > { %2153 = vmatpush3.msra.mxu1 %v839_v35 }
 0x19c   : > { %2155 = vmatmul.mubr.msk.f32.vlgmr.msra.gmra.mxu1 %vm660_vm0, %v838_v36  ;;  %2162 = vmatprep.subr.mxu1 %v2528_v12 }
 0x19d   : > { %2164 = vmatprep.mubr.msk.f32.mxu1 %vm2529_vm1, %v2528_v12 }
 0x254   : > { %v769_v38 = vpop.f32.mrf.mxu1 }
 0x255   : > { %v2838_v39 = vadd.f32 %v2057_v37, %v769_v38 }
 0x256   : > { %v2145_v40 = vpop.f32.mrf.mxu1 }
 0x257   : > { %784 = vst.msk [vmem:[#allocation2] sm:$0xff] %vm783_vm2, %v2838_v39  ;;  %774 = vrot.lane.b32.xlu0 %v2838_v39, %s2530_s18  ;;  %777 = vrot.lane.b32.xlu1 %v2838_v39, %s2531_s17 }
 0x25b   : > { %780 = vrot.lane.b32.xlu1 %v2838_v39, %s2532_s23 }
 0x25c   : > { %v919_v42 = vpop.f32.mrf.mxu1 }
 0x25d   : > { %v920_v43 = vadd.f32 %v2061_v41, %v919_v42 }
 0x25e   : > { %v2156_v44 = vpop.f32.mrf.mxu1  ;;  %v931_v45 = vld [vmem:[#allocation2] sm:$0xff] }
 0x25f   : > { %v923_v46 = vmul.f32 0.35355338, %v920_v43  ;;  %2158 = vmatpush3.xpose.msk.msra.mxu0 %vm783_vm2, %v931_v45 }
 0x260   : > { %2167 = vmatprep.subr.mxu0 %v2528_v12 }
 0x261   : > { %927 = vrot.lane.b32.xlu0 %v923_v46, %s2531_s17  ;;  %925 = vrot.lane.b32.xlu1 %v923_v46, %s2530_s18  ;;  %s1933_s18 = sshll.u32 %s652_s24, 4  ;;  %s1934_s18 = int_to_ptr.vmem [resolvable:$true] %s1933_s18 }
 0x262   : > { %2160 = vmatmul.mubr.msk.f32.vlgmr.msra.gmra.mxu0 %vm783_vm2, %v923_v46  ;;  %s2433_s12 = scalar_lea.vmem %s1934_s18, 128 }
 0x263   : > { %2169 = vmatprep.mubr.msk.f32.mxu0 %vm2529_vm1, %v2528_v12  ;;  %p2434_p1 = scmp.ne.s32.totalorder %s1934_s18, %s2433_s12 }
 0x265   : > { %929 = vrot.lane.b32.xlu1 %v923_v46, %s2532_s23  ;;  %s1931_s23 = scalar_lea.hbm %s3110_s22, %s2087_s27  ;;  %p2435_p4 = pnand %p2434_p1, %p2716_p0 }
 0x267   : > { %p2436_p8 = pneg %p2435_p4 }
 0x2c9   : > { %v2853_v47 = vpop.permute.xlu1 %777  ;;  %v2855_v48 = vpop.permute.xlu0 %774 }
 0x2ca   : > { %786 = vst.msk [vmem:[#allocation2 + $0x10] sm:$0xff] %vm783_vm2, %v2853_v47  ;;  %785 = vst.msk [vmem:[#allocation2 + $0x8] sm:$0xff] %vm783_vm2, %v2855_v48 }
 0x2cd   : > { %v2861_v49 = vpop.permute.xlu1 %780 }
 0x2ce   : > { %787 = vst.msk [vmem:[#allocation2 + $0x18] sm:$0xff] %vm783_vm2, %v2861_v49 }
 0x2d1   : > { %v933_v50 = vld [vmem:[#allocation2 + $0x10] sm:$0xff]  ;;  %v932_v51 = vld [vmem:[#allocation2 + $0x8] sm:$0xff] }
 0x2d2   : > { %2168 = vmatpush3.xpose.msk.msra.mxu0 %vm783_vm2, %v933_v50  ;;  %2163 = vmatpush3.xpose.msk.msra.mxu1 %vm783_vm2, %v932_v51  ;;  %v1602_v51 = vld [vmem:[%s3051_s8 + $0x18] sm:$0xff] }
 0x2d3   : > { %v926_v52 = vpop.permute.xlu1 %925  ;;  %2172 = vmatprep.subr.mxu1 %v2528_v12  ;;  %2177 = vmatprep.subr.mxu0 %v2528_v12  ;;  %v928_v53 = vpop.permute.xlu0 %927 }
 0x2d5   : > { %2165 = vmatmul.mubr.msk.f32.vlgmr.msra.gmra.mxu1 %vm783_vm2, %v926_v52  ;;  %2170 = vmatmul.mubr.msk.f32.vlgmr.msra.gmra.mxu0 %vm783_vm2, %v928_v53  ;;  %v934_v54 = vld [vmem:[#allocation2 + $0x18] sm:$0xff]  ;;  %v1601_v52 = vld [vmem:[%s3051_s8 + $0x10] sm:$0xff]  ;;  %v1600_v53 = vld [vmem:[%s3051_s8 + $0x8] sm:$0xff] }
 0x2d6   : > { %2173 = vmatpush3.xpose.msk.msra.mxu1 %vm783_vm2, %v934_v54  ;;  %2174 = vmatprep.mubr.msk.f32.mxu1 %vm2529_vm1, %v2528_v12 }
 0x2d7   : > { %2182 = vmatprep.subr.mxu1 %v2528_v12  ;;  %2179 = vmatprep.mubr.msk.f32.mxu0 %vm2529_vm1, %v2528_v12  ;;  %v930_v55 = vpop.permute.xlu1 %929 }
 0x2d9   : > { %2175 = vmatmul.mubr.msk.f32.vlgmr.msra.gmra.mxu1 %vm783_vm2, %v930_v55 }
 0x2da   : > { %2184 = vmatprep.mubr.msk.f32.mxu1 %vm2529_vm1, %v2528_v12 }
 0x322   : > { %v1013_v57 = vpop.f32.mrf.mxu0 }
 0x323   : > { %v1014_v58 = vadd.f32 %v2063_v56, %v1013_v57 }
 0x324   : > { %v2161_v59 = vpop.f32.mrf.mxu0 }
 0x325   : > { %v1242_v60 = vsel %vm783_vm2, %v1014_v58, -inf }
 0x326   : > { %1243 = vmax.xlane.f32.xlu0 %v1242_v60  ;;  %v1599_v60 = vld [vmem:[%s3051_s8] sm:$0xff] }
 0x395   : > { %v1088_v61 = vpop.f32.mrf.mxu1  ;;  %v1163_v62 = vpop.f32.mrf.mxu0 }
 0x396   : > { %v1089_v63 = vadd.f32 %v2063_v56, %v1088_v61  ;;  %v1164_v1 = vadd.f32 %v2063_v56, %v1163_v62 }
 0x397   : > { %v2166_v2 = vpop.f32.mrf.mxu1  ;;  %v2171_v3 = vpop.f32.mrf.mxu0 }
 0x398   : > { %v1245_v4 = vsel %vm783_vm2, %v1089_v63, -inf  ;;  %v1248_v5 = vsel %vm783_vm2, %v1164_v1, -inf }
 0x399   : > { %1246 = vmax.xlane.f32.xlu1 %v1245_v4  ;;  %v1238_v6 = vpop.f32.mrf.mxu1  ;;  %1249 = vmax.xlane.f32.xlu0 %v1248_v5 }
 0x39a   : > { %v1239_v7 = vadd.f32 %v2063_v56, %v1238_v6  ;;  %v2076_v6 = vld [vmem:[%s3052_s9] ss:$0 sm:$0xff] }
 0x39b   : > { %v2176_v8 = vpop.f32.mrf.mxu1 }
 0x39c   : > { %v1251_v9 = vsel %vm783_vm2, %v1239_v7, -inf }
 0x39d   : > { %1252 = vmax.xlane.f32.xlu0 %v1251_v9 }
 0x3af   : > { %v1244_v10 = vpop.xlane.xlu0 %1243 }
 0x3b0   : > { %v1254_v11 = vsub.f32 %v1014_v58, %v1244_v10 }
 0x3b2   : > { %v1258_v13 = vmul.f32 1.442695, %v1254_v11 }
 0x3b4   : > { %2331 = vpow2.f32 %v1258_v13 }
 0x3c1   : > { %v2332_v14 = vpop.eup %2331 }
 0x3c2   : > { %v1266_v15 = vsel %vm783_vm2, %v2332_v14, 0.0 }
 0x3c3   : > { %1267 = vadd.xlane.f32.xlu0 %v1266_v15 }
 0x422   : > { %v1247_v16 = vpop.xlane.xlu1 %1246  ;;  %v1250_v17 = vpop.xlane.xlu0 %1249 }
 0x423   : > { %v1255_v18 = vsub.f32 %v1089_v63, %v1247_v16  ;;  %v1256_v19 = vsub.f32 %v1164_v1, %v1250_v17 }
 0x425   : > { %v1260_v20 = vmul.f32 1.442695, %v1255_v18  ;;  %v1262_v21 = vmul.f32 1.442695, %v1256_v19  ;;  %v1716_v18 = vld [vmem:[#allocation9 + $0x18] sm:$0xff]  ;;  %v1715_v19 = vld [vmem:[#allocation9 + $0x10] sm:$0xff] }
 0x426   : > { %v1253_v26 = vpop.xlane.xlu0 %1252 }
 0x427   : > { %2333 = vpow2.f32 %v1260_v20  ;;  %v1257_v27 = vsub.f32 %v1239_v7, %v1253_v26  ;;  %v1714_v20 = vld [vmem:[#allocation9 + $0x8] sm:$0xff] }
 0x428   : > { %2335 = vpow2.f32 %v1262_v21  ;;  %v1805_v21 = vld [vmem:[%s3057_s14 + $0x38] sm:$0xff] }
 0x429   : > { %v1264_v28 = vmul.f32 1.442695, %v1257_v27 }
 0x42b   : > { %2337 = vpow2.f32 %v1264_v28 }
 0x434   : > { %v2334_v22 = vpop.eup %2333 }
 0x435   : > { %v2336_v23 = vpop.eup %2335  ;;  %v1269_v24 = vsel %vm783_vm2, %v2334_v22, 0.0 }
 0x436   : > { %1270 = vadd.xlane.f32.xlu1 %v1269_v24  ;;  %v1272_v25 = vsel %vm783_vm2, %v2336_v23, 0.0  ;;  %v1802_v24 = vld [vmem:[%s3057_s14 + $0x20] sm:$0xff] }
 0x437   : > { %1273 = vadd.xlane.f32.xlu0 %v1272_v25  ;;  %v1801_v25 = vld [vmem:[%s3057_s14 + $0x18] sm:$0xff] }
 0x438   : > { %v2338_v29 = vpop.eup %2337 }
 0x439   : > { %v1275_v30 = vsel %vm783_vm2, %v2338_v29, 0.0 }
 0x447   : > { %790 = vrot.lane.b32.xlu1 %v2855_v48, %s2533_s2 }
 0x44b   : > { %792 = vrot.lane.b32.xlu1 %v2853_v47, %s2533_s2 }
 0x44c   : > { %v1268_v31 = vpop.xlane.xlu0 %1267 }
 0x44d   : > { %788 = vrot.lane.b32.xlu0 %v2838_v39, %s2533_s2  ;;  %2339 = vrcp.f32 %v1268_v31 }
 0x45a   : > { %v2340_v37 = vpop.eup %2339 }
 0x45b   : > { %v1282_v40 = vmul.f32 %v2340_v37, %v2332_v14  ;;  %v1798_v37 = vld [vmem:[%s3057_s14] sm:$0xff] }
 0x46f   : > { %1276 = vadd.xlane.f32.xlu1 %v1275_v30 }
 0x480   : > { %794 = vrot.lane.b32.xlu1 %v2861_v49, %s2533_s2  ;;  %s3104_s2 = sld [smem:[#allocation29_spill]] }
 0x4bf   : > { %v1271_v32 = vpop.xlane.xlu1 %1270 }
 0x4c0   : > { %2341 = vrcp.f32 %v1271_v32  ;;  %v1274_v33 = vpop.xlane.xlu0 %1273  ;;  %v2079_v32 = vld [vmem:[%s3103_s21] ss:$0 sm:$0xff] }
 0x4c1   : > { %2343 = vrcp.f32 %v1274_v33 }
 0x4c3   : > { %v791_v34 = vpop.permute.xlu1 %790 }
 0x4c4   : > { %801 = vst.msk [vmem:[#allocation3 + $0x8] sm:$0xff] %vm783_vm2, %v791_v34  ;;  %v789_v35 = vpop.permute.xlu0 %788 }
 0x4c5   : > { %800 = vst.msk [vmem:[#allocation3] sm:$0xff] %vm783_vm2, %v789_v35  ;;  %v1800_v35 = vld [vmem:[%s3057_s14 + $0x10] sm:$0xff] }
 0x4c7   : > { %v793_v36 = vpop.permute.xlu1 %792 }
 0x4c8   : > { %802 = vst.msk [vmem:[#allocation3 + $0x10] sm:$0xff] %vm783_vm2, %v793_v36  ;;  %v1799_v36 = vld [vmem:[%s3057_s14 + $0x8] sm:$0xff] }
 0x4cb   : > { %v1287_v38 = vld [vmem:[#allocation3 + $0x8] sm:$0xff] }
 0x4cc   : > { %v1286_v39 = vld [vmem:[#allocation3] sm:$0xff]  ;;  %2183 = vmatpush3.msra.mxu1 %v1287_v38 }
 0x4cd   : > { %v2342_v41 = vpop.eup %2341  ;;  %2178 = vmatpush3.msra.mxu0 %v1286_v39  ;;  %2192 = vmatprep.subr.mxu1 %v2528_v12  ;;  %v2080_v38 = vld [vmem:[%s3104_s2] ss:$0 sm:$0xff]  ;;  %s1919_s2 = scalar_lea.sflag [#allocation6], %s2757_s11 }
 0x4ce   : > { %v2344_v42 = vpop.eup %2343  ;;  %2180 = vmatmul.mubr.msk.f32.vlgmr.msra.gmra.mxu0 %vm783_vm2, %v1282_v40  ;;  %2187 = vmatprep.subr.mxu0 %v2528_v12  ;;  %v1283_v43 = vmul.f32 %v2342_v41, %v2334_v22  ;;  %v1804_v22 = vld [vmem:[%s3057_s14 + $0x30] sm:$0xff] }
 0x4cf   : > { %v1288_v44 = vld [vmem:[#allocation3 + $0x10] sm:$0xff]  ;;  %2189 = vmatprep.mubr.msk.f32.mxu0 %vm2529_vm1, %v2528_v12  ;;  %v1284_v45 = vmul.f32 %v2344_v42, %v2336_v23  ;;  %v1803_v23 = vld [vmem:[%s3057_s14 + $0x28] sm:$0xff] }
 0x4d0   : > { %2185 = vmatmul.mubr.msk.f32.vlgmr.msra.gmra.mxu1 %vm783_vm2, %v1283_v43  ;;  %2188 = vmatpush3.msra.mxu0 %v1288_v44  ;;  %v2082_v43 = vld [vmem:[%s3105_s13] ss:$0 sm:$0xff]  ;;  %s2437_s13 = sshll.u32 %s2537_s20, 4  ;;  %s2438_s13 = int_to_ptr.vmem [resolvable:$false] %s2437_s13 }
 0x4d1   : > { %2194 = vmatprep.mubr.msk.f32.mxu1 %vm2529_vm1, %v2528_v12  ;;  %2197 = vmatprep.subr.mxu0 %v2528_v12  ;;  %s2439_s15 = scalar_lea.vmem %s2438_s13, 256  ;;  %p2440_p5 = scmp.lt.s32.totalorder %s1934_s18, %s2438_s13 }
 0x4d2   : > { %2190 = vmatmul.mubr.msk.f32.vlgmr.msra.gmra.mxu0 %vm783_vm2, %v1284_v45  ;;  %p2441_p7 = scmp.lt.s32.totalorder %s2439_s15, %s2433_s12 }
 0x4d3   : > { %2205 = vmatprep.mubr.msk.f32.mxu0 %vm2529_vm1, %v2528_v12  ;;  %2198 = vmatpush3.msra.mxu0 %v1602_v51 }
 0x4d4   : > { %2199 = vmatprep.subr.mxu0 %v2528_v12  ;;  %p2442_p2 = por %p2441_p7, %p2440_p5 }
 0x4d5   : > { %2200 = vmatpush3.msra.mxu0 %v1601_v52 }
 0x4d6   : > { %2201 = vmatprep.subr.mxu0 %v2528_v12  ;;  %p2443_p6 = pnand %p2442_p2, %p2436_p8 }
 0x4d7   : > { %2202 = vmatpush3.msra.mxu0 %v1600_v53 }
 0x4d8   : > { %2203 = vmatprep.subr.mxu0 %v2528_v12 }
 0x4d9   : > { %2204 = vmatpush3.msra.mxu0 %v1599_v60 }
 0x4da   : > { %2219 = vmatprep.subr.mxu0 %v2528_v12 }
 0x4f8   : > { %v1277_v46 = vpop.xlane.xlu1 %1276 }
 0x4f9   : > { %2345 = vrcp.f32 %v1277_v46 }
 0x4fc   : > { %v795_v47 = vpop.permute.xlu1 %794 }
 0x4fd   : > { %803 = vst.msk [vmem:[#allocation3 + $0x18] sm:$0xff] %vm783_vm2, %v795_v47 }
 0x504   : > { %v1289_v48 = vld [vmem:[#allocation3 + $0x18] sm:$0xff] }
 0x505   : > { %2193 = vmatpush3.msra.mxu1 %v1289_v48 }
 0x506   : > { %v2346_v49 = vpop.eup %2345  ;;  %2208 = vmatprep.subr.mxu1 %v2528_v12 }
 0x507   : > { %v1285_v50 = vmul.f32 %v2346_v49, %v2338_v29 }
 0x509   : > { %2195 = vmatmul.mubr.msk.f32.vlgmr.msra.gmra.mxu1 %vm783_vm2, %v1285_v50 }
 0x50a   : > { %2216 = vmatprep.mubr.msk.f32.mxu1 %vm2529_vm1, %v2528_v12  ;;  %2209 = vmatpush3.msra.mxu1 %v1716_v18 }
 0x50b   : > { %2210 = vmatprep.subr.mxu1 %v2528_v12 }
 0x50c   : > { %2211 = vmatpush3.msra.mxu1 %v1715_v19 }
 0x50d   : > { %2212 = vmatprep.subr.mxu1 %v2528_v12 }
 0x50e   : > { %2213 = vmatpush3.msra.mxu1 %v1714_v20 }
 0x50f   : > { %2214 = vmatprep.subr.mxu1 %v2528_v12 }
 0x58e   : > { %v1359_v54 = vpop.f32.mrf.mxu0 }
 0x590   : > { %v2181_v55 = vpop.f32.mrf.mxu0  ;;  %v1432_v56 = vpop.f32.mrf.mxu1 }
 0x591   : > { %1583 = vrot.lane.b32.xlu0 %v1432_v56, %s2534_s10  ;;  %s3102_s10 = sld [smem:[#allocation26_spill]] }
 0x592   : > { %v1505_v57 = vpop.f32.mrf.mxu0  ;;  %v2186_v58 = vpop.f32.mrf.mxu1 }
 0x593   : > { %1587 = vrot.lane.b32.xlu1 %v1505_v57, %s2535_s19  ;;  %s3108_s19 = sld [smem:[#allocation31_spill]] }
 0x594   : > { %v2191_v59 = vpop.f32.mrf.mxu0 }
 0x597   : > { %v2078_v30 = vld [vmem:[%s3102_s10] ss:$0 sm:$0xff] }
 0x599   : > { %v2084_v57 = vld [vmem:[%s3108_s19] ss:$0 sm:$0xff] }
 0x5c9   : > { %v1578_v61 = vpop.f32.mrf.mxu1 }
 0x5ca   : > { %1591 = vrot.lane.b32.xlu0 %v1578_v61, %s2536_s25  ;;  %s3109_s25 = sld [smem:[#allocation32_spill]] }
 0x5cb   : > { %v2196_v62 = vpop.f32.mrf.mxu1 }
 0x5d0   : > { %v2085_v59 = vld [vmem:[%s3109_s25] ss:$0 sm:$0xff] }
 0x603   : > { %v1584_v63 = vpop.permute.xlu0 %1583 }
 0x604   : > { %v1594_v1 = vsel %vm783_vm2, %v1359_v54, %v1584_v63 }
 0x605   : > { %v1588_v2 = vpop.permute.xlu1 %1587 }
 0x606   : > { %v1596_v3 = vsel %vm1595_vm3, %v1594_v1, %v1588_v2 }
 0x63c   : > { %v1592_v4 = vpop.permute.xlu0 %1591 }
 0x63d   : > { %v1598_v5 = vsel %vm1597_vm4, %v1596_v3, %v1592_v4 }
 0x63e   : > { %2206 = vmatmul.mubr.msk.f32.vlgmr.msra.gmra.mxu0 %vm660_vm0, %v1598_v5 }
 0x63f   : > { %2235 = vmatprep.mubr.msk.f32.mxu0 %vm2529_vm1, %v2528_v12  ;;  %2220 = vmatpush3.msra.mxu0 %v1805_v21 }
 0x640   : > { %2221 = vmatprep.subr.mxu0 %v2528_v12 }
 0x641   : > { %2222 = vmatpush3.msra.mxu0 %v1804_v22 }
 0x642   : > { %2223 = vmatprep.subr.mxu0 %v2528_v12 }
 0x643   : > { %2224 = vmatpush3.msra.mxu0 %v1803_v23 }
 0x644   : > { %2225 = vmatprep.subr.mxu0 %v2528_v12 }
 0x645   : > { %2226 = vmatpush3.msra.mxu0 %v1802_v24 }
 0x646   : > { %2227 = vmatprep.subr.mxu0 %v2528_v12 }
 0x647   : > { %2228 = vmatpush3.msra.mxu0 %v1801_v25 }
 0x648   : > { %2229 = vmatprep.subr.mxu0 %v2528_v12 }
 0x649   : > { %2230 = vmatpush3.msra.mxu0 %v1800_v35 }
 0x64a   : > { %2231 = vmatprep.subr.mxu0 %v2528_v12 }
 0x64b   : > { %2232 = vmatpush3.msra.mxu0 %v1799_v36 }
 0x64c   : > { %2233 = vmatprep.subr.mxu0 %v2528_v12 }
 0x64d   : > { %2234 = vmatpush3.msra.mxu0 %v1798_v37 }
 0x6fe   : > { %v1679_v7 = vpop.f32.mrf.mxu0 }
 0x6ff   : > { %v1680_v8 = vadd.f32 %v2076_v6, %v1679_v7 }
 0x700   : > { %v2207_v9 = vpop.f32.mrf.mxu0 }
 0x701   : > { %v2938_v10 = vadd.f32 %v1680_v8, %v2777_v0  ;;  %v1713_v0 = vld [vmem:[#allocation9] sm:$0xff] }
 0x702   : > { %2215 = vmatpush3.msra.mxu1 %v1713_v0 }
 0x703   : > { %v1686_v11 = vsel %vm660_vm0, %v2938_v10, 0.0 }
 0x704   : > { %1687 = vadd.xlane.f32.xlu1 %v1686_v11 }
 0x78d   : > { %v1688_v13 = vpop.xlane.xlu1 %1687 }
 0x78e   : > { %v1689_v14 = vmul.f32 0.03125, %v1688_v13 }
 0x790   : > { %v1690_v15 = vsub.f32 %v2938_v10, %v1689_v14 }
 0x792   : > { %v1691_v16 = vmul.f32 %v1690_v15, %v1690_v15 }
 0x794   : > { %v1692_v17 = vsel %vm660_vm0, %v1691_v16, 0.0 }
 0x795   : > { %1693 = vadd.xlane.f32.xlu0 %v1692_v17 }
 0x81e   : > { %v1694_v26 = vpop.xlane.xlu0 %1693 }
 0x81f   : > { %v1695_v27 = vmul.f32 0.03125, %v1694_v26 }
 0x821   : > { %v1696_v28 = vadd.f32 1e-05, %v1695_v27 }
 0x823   : > { %2347 = vrsqrt.f32 %v1696_v28 }
 0x830   : > { %v2348_v29 = vpop.eup %2347 }
 0x831   : > { %v1698_v31 = vmul.f32 %v2348_v29, %v1690_v15 }
 0x833   : > { %v1705_v33 = vmul.f32 %v2078_v30, %v1698_v31 }
 0x835   : > { %v1712_v34 = vadd.f32 %v2079_v32, %v1705_v33 }
 0x837   : > { %2217 = vmatmul.mubr.msk.f32.vlgmr.msra.gmra.mxu1 %vm660_vm0, %v1712_v34 }
 0x8f7   : > { %v1793_v39 = vpop.f32.mrf.mxu1 }
 0x8f8   : > { %v1794_v40 = vadd.f32 %v2080_v38, %v1793_v39 }
 0x8f9   : > { %v2218_v41 = vpop.f32.mrf.mxu1 }
 0x8fa   : > { %v1797_v42 = vmax.f32 %v1794_v40, 0.0 }
 0x8fc   : > { %2236 = vmatmul.mubr.msk.f32.vlgmr.msra.gmra.mxu0 %vm1813_vm5, %v1797_v42 }
 0x9bc   : > { %v1883_v44 = vpop.f32.mrf.mxu0 }
 0x9bd   : > { %v1884_v45 = vadd.f32 %v2082_v43, %v1883_v44 }
 0x9be   : > { %v2237_v46 = vpop.f32.mrf.mxu0 }
 0x9bf   : > { %v1887_v12 = vadd.f32 %v1884_v45, %v2938_v10 }
 0x9c1   : > { %v1890_v47 = vsel %vm660_vm0, %v1887_v12, 0.0 }
 0x9c2   : > { %1891 = vadd.xlane.f32.xlu0 %v1890_v47 }
 0xa4b   : > { %v1892_v48 = vpop.xlane.xlu0 %1891 }
 0xa4c   : > { %v1893_v49 = vmul.f32 0.03125, %v1892_v48 }
 0xa4e   : > { %v1894_v50 = vsub.f32 %v1887_v12, %v1893_v49 }
 0xa50   : > { %v1895_v51 = vmul.f32 %v1894_v50, %v1894_v50 }
 0xa52   : > { %v1896_v52 = vsel %vm660_vm0, %v1895_v51, 0.0 }
 0xa53   : > { %1897 = vadd.xlane.f32.xlu0 %v1896_v52 }
 0xadc   : > { %v1898_v53 = vpop.xlane.xlu0 %1897 }
 0xadd   : > { %v1899_v54 = vmul.f32 0.03125, %v1898_v53 }
 0xadf   : > { %v1900_v55 = vadd.f32 1e-05, %v1899_v54 }
 0xae1   : > { %2349 = vrsqrt.f32 %v1900_v55 }
 0xaee   : > { %v2350_v56 = vpop.eup %2349 }
 0xaef   : > { %v1902_v58 = vmul.f32 %v2350_v56, %v1894_v50 }
 0xaf1   : > { %v1909_v60 = vmul.f32 %v2084_v57, %v1902_v58 }
 0xaf3   : > { %v1916_v61 = vadd.f32 %v2085_v59, %v1909_v60 }
 0xaf5   : > { %1917 = vst.msk [vmem:[%s652_s24] sm:$0xff] %vm660_vm0, %v1916_v61 }
 0xaf6   : > { %2446 = shalt.err (!%p2443_p6)
}
 0xaf7   : > { %s2447_s16 = scalar_lea.hbm %s1931_s23, 128  ;;  %s2451_s10 = scalar_lea.hbm %s3110_s22, 256 }
 0xaf8   : > { %p2448_p9 = scmp.ne.s32.totalorder %s1931_s23, %s2447_s16  ;;  %p2452_p11 = scmp.lt.s32.totalorder %s1931_s23, %s3110_s22 }
 0xaf9   : > { %p2453_p3 = scmp.lt.s32.totalorder %s2451_s10, %s2447_s16 }
 0xafa   : > { %p2449_p12 = pnand %p2448_p9, %p2716_p0 }
 0xafb   : > { %p2454_p1 = por %p2453_p3, %p2452_p11 }
 0xafc   : > { %p2450_p13 = pneg %p2449_p12 }
 0xafe   : > { %p2455_p4 = pnand %p2454_p1, %p2450_p13 }
 0xb00   : > { %2458 = shalt.err (!%p2455_p4)
}
 0xb01   : > { %2246 = dma.vmem_to_hbm [thread:$0]  (%p2716_p0), %s1934_s18, 128, %s1931_s23, %s1919_s2  }
 0xb02 PF: > { %s3111_s21 = sld [smem:[#allocation15_spill]] }
 0xb03   : > { %s3112_s25 = sld [smem:[#allocation19_spill]] }
 0xb04   : > { %s3113_s27 = sld [smem:[#allocation18_spill]] }
 0xb08   : > { %s1945_s24 = sand.u32 1, %s3111_s21  }
 0xb09   : > { %p3114_p8 = scmp.ne.s32.totalorder %s3112_s25, 0  ;;  %s1946_s17 = scalar_lea.sflag [#allocation6], %s1945_s24 }
 0xb0b   : > { %p2260_p5 = pnand %p2047_p10, %p3114_p8 }
 0xb0d   : > { %p2261_p7 = pneg %p2260_p5 }
 0xb0f   : > { %2496 = dma.done.wait (%p2261_p7), %s1946_s17, 128  }
 0xb10   : > { %2498 = vsyncadd (%p2261_p7), %s1946_s17, 4294967168  ;;  %s37_s19 = sadd.s32 1, %s3113_s27   ;;  %s3115_s30 = sld [smem:[#allocation16_spill]] }
 0xb11   : > { %p34_p2 = scmp.ge.s32.totalorder %s37_s19, 4   ;;  %s3116_s29 = sld [smem:[#allocation22_spill]] }
 0xb12   : > { %s3117_s18 = sld [smem:[#allocation20_spill]]  ;;  %s3118_s27 = smov %s2505_s28 }
 0xb14   :  { %36 = sbr.rel (!%p34_p2) target bundleno = 20 (0x14), region = 159 }
 0xb16   : > { %s3119_s28 = smov %s3115_s30  ;;  %s3120_s30 = smov %s2517_s0 }
 0xb18   : > { %s3121_s0 = smov %s3117_s18 }
 0xb19   :  { %1951 = vsyncpa [#allocation5], 1 }
 0xb1a   :  { %1953 = vsyncpa [#allocation5 + $0x1], 1 }
 0xb1b   :  { %1954 = vsyncpa [#allocation8], 1 }
 0xb1c   :  { %1956 = vsyncpa [#allocation8 + $0x1], 1 }
 0xb1d   :  { %1957 = vsyncpa [#allocation6], 1 }
 0xb1e   :  { %1959 = vsyncpa [#allocation6 + $0x1], 1 }

</bundles_post_ra>
